<compile_context>
chip_gen: v7x
topology: tpu7x:2x2x1
jax: 0.10.0
libtpu: 0.0.40
codegen_flags: <defaults>
</compile_context>

<pallas_src>
import functools

import jax
import jax.numpy as jnp
from jax.experimental import pallas as pl
from jax.experimental.pallas import tpu as pltpu

BN_EPS = 1e-5


def _round_up(x, m):
    return (x + m - 1) // m * m


def devlayer2d_kernel(x_ref, w_ref, params_ref, mask_ref, out_ref, *,
                      kh, kw, wp, inv_n, bn_eps):
    """Fused Conv5x5 + W-scale + BatchNorm(train) + ReLU, one VMEM block.

    x_ref      : (Cin_p, M_in)        flattened zero-padded input, channels-first
    w_ref      : (kh*kw, Cout, Cin_p) per-tap weight matrices (W scale folded in)
    params_ref : (Cout, 3)            packed [bias*W, gamma, beta]
    mask_ref   : (1, M_out)           1.0 at valid (strided) output positions
    out_ref    : (Cout, M_out)        lane-dense output (M_out = N * padded spatial)
    """
    cout, m_out = out_ref.shape

    # --- Conv2d as 25 shifted-window MXU matmuls into a lane-dense accumulator ---
    acc = jnp.zeros((cout, m_out), dtype=jnp.float32)
    for i in range(kh):
        for j in range(kw):
            off = i * wp + j                         # constant lane offset per tap
            window = x_ref[:, off:off + m_out]       # (Cin_p, M_out)
            acc = acc + jnp.dot(w_ref[i * kw + j], window,
                                preferred_element_type=jnp.float32)

    bias = params_ref[:, 0:1]     # (Cout, 1), already scaled by W
    gamma = params_ref[:, 1:2]
    beta = params_ref[:, 2:3]
    y = acc + bias                # == W * (conv(x) + b)

    # --- BatchNorm2d, training-mode batch stats over valid positions only ---
    mask = mask_ref[...]          # (1, M_out)
    ym = y * mask
    mean = jnp.sum(ym, axis=1, keepdims=True) * inv_n            # (Cout, 1)
    var = jnp.sum(ym * y, axis=1, keepdims=True) * inv_n - mean * mean
    y = (y - mean) * jax.lax.rsqrt(var + bn_eps)
    y = y * gamma + beta

    # --- ReLU ---
    y = jnp.maximum(y, 0.0)
    # TODO(synk): nn.Dropout(0.2) in train() has no PyTorch-RNG-matching
    # equivalent; applied as identity (eval semantics).
    out_ref[...] = y.astype(out_ref.dtype)


def devlayer2d_forward(x_nchw, conv_w, conv_b, W_param, gamma, beta, *, stride=1):
    """x_nchw: (N, Cin, H, W); conv_w: (Cout, Cin, 5, 5). Returns NCHW output."""
    N, Cin, H, W = x_nchw.shape
    Cout = conv_w.shape[0]
    kh = kw = 5
    pad = 2

    Hp, Wp = H + 2 * pad, W + 2 * pad
    Ho1, Wo1 = Hp - kh + 1, Wp - kw + 1              # stride-1 output extent (== H, W)
    Ho = (H + 2 * pad - kh) // stride + 1
    Wo = (W + 2 * pad - kw) // stride + 1

    cin_p = _round_up(Cin, 8)                        # sublane-aligned contraction dim
    s_img = _round_up(Hp * Wp, 128)                  # lane-aligned per-image spatial block
    m_out = N * s_img                                # lane-dense output width
    m_in = _round_up(m_out + (kh - 1) * Wp + (kw - 1), 128)

    # --- input: channels-first, spatially zero-padded, flattened per image ---
    x = jnp.transpose(x_nchw, (1, 0, 2, 3)).astype(jnp.float32)          # (Cin, N, H, W)
    x = jnp.pad(x, ((0, cin_p - Cin), (0, 0), (pad, pad), (pad, pad)))   # (Cin_p, N, Hp, Wp)
    x = x.reshape(cin_p, N, Hp * Wp)
    x = jnp.pad(x, ((0, 0), (0, 0), (0, s_img - Hp * Wp))).reshape(cin_p, m_out)
    x_flat = jnp.pad(x, ((0, 0), (0, m_in - m_out)))

    # --- weights: fold per-channel W scale, split into 25 (Cout, Cin_p) taps ---
    w_vec = W_param.reshape(-1).astype(jnp.float32)                      # (Cout,)
    w_eff = conv_w.astype(jnp.float32) * w_vec[:, None, None, None]
    w_taps = jnp.transpose(w_eff, (2, 3, 0, 1)).reshape(kh * kw, Cout, Cin)
    w_taps = jnp.pad(w_taps, ((0, 0), (0, 0), (0, cin_p - Cin)))

    # --- packed per-channel params: [bias*W, gamma, beta] ---
    params = jnp.stack([conv_b.astype(jnp.float32) * w_vec,
                        gamma.astype(jnp.float32),
                        beta.astype(jnp.float32)], axis=1)               # (Cout, 3)

    # --- validity mask for BN statistics (strided output positions only) ---
    hh = jnp.arange(Hp)
    ww = jnp.arange(Wp)
    valid_h = (hh < Ho1) & (hh % stride == 0)
    valid_w = (ww < Wo1) & (ww % stride == 0)
    valid = (valid_h[:, None] & valid_w[None, :]).reshape(-1)
    valid = jnp.pad(valid, (0, s_img - Hp * Wp))
    mask = jnp.tile(valid, N).astype(jnp.float32).reshape(1, m_out)
    n_valid = N * Ho * Wo

    kernel = functools.partial(devlayer2d_kernel, kh=kh, kw=kw, wp=Wp,
                               inv_n=1.0 / float(n_valid), bn_eps=BN_EPS)

    out_t = pl.pallas_call(
        kernel,
        out_shape=jax.ShapeDtypeStruct((Cout, m_out), jnp.float32),
        grid_spec=pl.GridSpec(
            grid=(1,),
            in_specs=[
                pl.BlockSpec((cin_p, m_in), lambda i: (0, 0)),
                pl.BlockSpec((kh * kw, Cout, cin_p), lambda i: (0, 0, 0)),
                pl.BlockSpec((Cout, 3), lambda i: (0, 0)),
                pl.BlockSpec((1, m_out), lambda i: (0, 0)),
            ],
            out_specs=pl.BlockSpec((Cout, m_out), lambda i: (0, 0)),
        ),
        compiler_params=pltpu.CompilerParams(dimension_semantics=("arbitrary",)),
    )(x_flat, w_taps, params, mask)

    # --- restore NCHW: crop padded spatial block, apply stride, transpose ---
    y = out_t.reshape(Cout, N, s_img)[:, :, :Hp * Wp].reshape(Cout, N, Hp, Wp)
    y = y[:, :, 0:Ho1:stride, 0:Wo1:stride]           # (Cout, N, Ho, Wo)
    return jnp.transpose(y, (1, 0, 2, 3))


def _reference_forward(x, conv_w, conv_b, W_param, gamma, beta, *, stride=1):
    """Pure-JAX reference (training-mode BN, dropout as identity)."""
    y = jax.lax.conv_general_dilated(
        x.astype(jnp.float32), conv_w.astype(jnp.float32),
        window_strides=(stride, stride), padding=((2, 2), (2, 2)),
        dimension_numbers=("NCHW", "OIHW", "NCHW"),
        precision=jax.lax.Precision.HIGHEST)
    y = y + conv_b.reshape(1, -1, 1, 1)
    y = W_param * y
    mean = jnp.mean(y, axis=(0, 2, 3), keepdims=True)
    var = jnp.mean(jnp.square(y - mean), axis=(0, 2, 3), keepdims=True)
    y = (y - mean) * jax.lax.rsqrt(var + BN_EPS)
    y = y * gamma.reshape(1, -1, 1, 1) + beta.reshape(1, -1, 1, 1)
    return jnp.maximum(y, 0.0)


if __name__ == "__main__":
    # DevLayer2D(input_size=4, output_size=8, stride=1, enable_W=True)
    N, Cin, H, W = 2, 4, 16, 16
    Cout, stride = 8, 1

    key = jax.random.PRNGKey(0)
    kx, kw_, kb = jax.random.split(key, 3)

    x = jax.random.normal(kx, (N, Cin, H, W), dtype=jnp.float32)

    # parameter init matching the module's shapes (conv weight/bias random,
    # W = ones, BatchNorm gamma = ones / beta = zeros)
    fan_in = Cin * 5 * 5
    bound = 1.0 / (fan_in ** 0.5)
    conv_w = jax.random.uniform(kw_, (Cout, Cin, 5, 5), jnp.float32, -bound, bound)
    conv_b = jax.random.uniform(kb, (Cout,), jnp.float32, -bound, bound)
    W_param = jnp.ones((1, Cout, 1, 1), jnp.float32)
    gamma = jnp.ones((Cout,), jnp.float32)
    beta = jnp.zeros((Cout,), jnp.float32)

    out = devlayer2d_forward(x, conv_w, conv_b, W_param, gamma, beta, stride=stride)
    out = jax.block_until_ready(out)
    assert out.shape == (N, Cout, (H - 1) // stride + 1, (W - 1) // stride + 1)

    ref = _reference_forward(x, conv_w, conv_b, W_param, gamma, beta, stride=stride)
    ref = jax.block_until_ready(ref)
    assert jnp.max(jnp.abs(out - ref)) < 2e-3, float(jnp.max(jnp.abs(out - ref)))

    print("KERNEL_OK")
</pallas_src>

<mosaic_0001>
module attributes {stable_mosaic.version = 11 : i64} {
  func.func @devlayer2d_kernel(%arg0: i32, %arg1: memref<8x1152xf32, #tpu.memory_space<vmem>>, %arg2: memref<25x8x8xf32, #tpu.memory_space<vmem>>, %arg3: memref<8x3xf32, #tpu.memory_space<vmem>>, %arg4: memref<1x1024xf32, #tpu.memory_space<vmem>>, %arg5: memref<8x1024xf32, #tpu.memory_space<vmem>>) attributes {dimension_semantics = [#tpu.dimension_semantics<arbitrary>], iteration_bounds = array<i64: 1>, scalar_prefetch = 0 : i64, scratch_operands = 0 : i64, tpu.core_type = #tpu.core_type<tc>, window_params = [{pipeline_mode = #tpu.pipeline_mode<synchronous>, transform_indices = @transform_0, window_bounds = array<i64: 8, 1152>}, {pipeline_mode = #tpu.pipeline_mode<synchronous>, transform_indices = @transform_1, window_bounds = array<i64: 25, 8, 8>}, {pipeline_mode = #tpu.pipeline_mode<synchronous>, transform_indices = @transform_2, window_bounds = array<i64: 8, 3>}, {pipeline_mode = #tpu.pipeline_mode<synchronous>, transform_indices = @transform_3, window_bounds = array<i64: 1, 1024>}, {pipeline_mode = #tpu.pipeline_mode<synchronous>, transform_indices = @transform_4, window_bounds = array<i64: 8, 1024>}]} {
    %cst = arith.constant 0.000000e+00 : f32
    %0 = vector.broadcast %cst : f32 to vector<8x1024xf32>
    %c0 = arith.constant 0 : index
    %c0_0 = arith.constant 0 : index
    %1 = vector.load %arg1[%c0, %c0_0] : memref<8x1152xf32, #tpu.memory_space<vmem>>, vector<8x1024xf32>
    %c0_1 = arith.constant 0 : index
    %c0_2 = arith.constant 0 : index
    %c0_3 = arith.constant 0 : index
    %2 = vector.load %arg2[%c0_1, %c0_2, %c0_3] : memref<25x8x8xf32, #tpu.memory_space<vmem>>, vector<1x8x8xf32>
    %3 = vector.shape_cast %2 : vector<1x8x8xf32> to vector<8x8xf32>
    %cst_4 = arith.constant dense<0.000000e+00> : vector<8x1024xf32>
    %4 = tpu.matmul %3, %1, %cst_4 {dimension_numbers = #tpu.dot_dimension_numbers<[1], [0], [0], [1], [0, 0, 1, 1], [], []>} : vector<8x8xf32>, vector<8x1024xf32>, vector<8x1024xf32> -> vector<8x1024xf32>
    %5 = arith.addf %0, %4 : vector<8x1024xf32>
    %c0_5 = arith.constant 0 : index
    %c1 = arith.constant 1 : index
    %6 = vector.load %arg1[%c0_5, %c1] : memref<8x1152xf32, #tpu.memory_space<vmem>>, vector<8x1024xf32>
    %c1_6 = arith.constant 1 : index
    %c0_7 = arith.constant 0 : index
    %c0_8 = arith.constant 0 : index
    %7 = vector.load %arg2[%c1_6, %c0_7, %c0_8] : memref<25x8x8xf32, #tpu.memory_space<vmem>>, vector<1x8x8xf32>
    %8 = vector.shape_cast %7 : vector<1x8x8xf32> to vector<8x8xf32>
    %cst_9 = arith.constant dense<0.000000e+00> : vector<8x1024xf32>
    %9 = tpu.matmul %8, %6, %cst_9 {dimension_numbers = #tpu.dot_dimension_numbers<[1], [0], [0], [1], [0, 0, 1, 1], [], []>} : vector<8x8xf32>, vector<8x1024xf32>, vector<8x1024xf32> -> vector<8x1024xf32>
    %10 = arith.addf %5, %9 : vector<8x1024xf32>
    %c0_10 = arith.constant 0 : index
    %c2 = arith.constant 2 : index
    %11 = vector.load %arg1[%c0_10, %c2] : memref<8x1152xf32, #tpu.memory_space<vmem>>, vector<8x1024xf32>
    %c2_11 = arith.constant 2 : index
    %c0_12 = arith.constant 0 : index
    %c0_13 = arith.constant 0 : index
    %12 = vector.load %arg2[%c2_11, %c0_12, %c0_13] : memref<25x8x8xf32, #tpu.memory_space<vmem>>, vector<1x8x8xf32>
    %13 = vector.shape_cast %12 : vector<1x8x8xf32> to vector<8x8xf32>
    %cst_14 = arith.constant dense<0.000000e+00> : vector<8x1024xf32>
    %14 = tpu.matmul %13, %11, %cst_14 {dimension_numbers = #tpu.dot_dimension_numbers<[1], [0], [0], [1], [0, 0, 1, 1], [], []>} : vector<8x8xf32>, vector<8x1024xf32>, vector<8x1024xf32> -> vector<8x1024xf32>
    %15 = arith.addf %10, %14 : vector<8x1024xf32>
    %c0_15 = arith.constant 0 : index
    %c3 = arith.constant 3 : index
    %16 = vector.load %arg1[%c0_15, %c3] : memref<8x1152xf32, #tpu.memory_space<vmem>>, vector<8x1024xf32>
    %c3_16 = arith.constant 3 : index
    %c0_17 = arith.constant 0 : index
    %c0_18 = arith.constant 0 : index
    %17 = vector.load %arg2[%c3_16, %c0_17, %c0_18] : memref<25x8x8xf32, #tpu.memory_space<vmem>>, vector<1x8x8xf32>
    %18 = vector.shape_cast %17 : vector<1x8x8xf32> to vector<8x8xf32>
    %cst_19 = arith.constant dense<0.000000e+00> : vector<8x1024xf32>
    %19 = tpu.matmul %18, %16, %cst_19 {dimension_numbers = #tpu.dot_dimension_numbers<[1], [0], [0], [1], [0, 0, 1, 1], [], []>} : vector<8x8xf32>, vector<8x1024xf32>, vector<8x1024xf32> -> vector<8x1024xf32>
    %20 = arith.addf %15, %19 : vector<8x1024xf32>
    %c0_20 = arith.constant 0 : index
    %c4 = arith.constant 4 : index
    %21 = vector.load %arg1[%c0_20, %c4] : memref<8x1152xf32, #tpu.memory_space<vmem>>, vector<8x1024xf32>
    %c4_21 = arith.constant 4 : index
    %c0_22 = arith.constant 0 : index
    %c0_23 = arith.constant 0 : index
    %22 = vector.load %arg2[%c4_21, %c0_22, %c0_23] : memref<25x8x8xf32, #tpu.memory_space<vmem>>, vector<1x8x8xf32>
    %23 = vector.shape_cast %22 : vector<1x8x8xf32> to vector<8x8xf32>
    %cst_24 = arith.constant dense<0.000000e+00> : vector<8x1024xf32>
    %24 = tpu.matmul %23, %21, %cst_24 {dimension_numbers = #tpu.dot_dimension_numbers<[1], [0], [0], [1], [0, 0, 1, 1], [], []>} : vector<8x8xf32>, vector<8x1024xf32>, vector<8x1024xf32> -> vector<8x1024xf32>
    %25 = arith.addf %20, %24 : vector<8x1024xf32>
    %c0_25 = arith.constant 0 : index
    %c20 = arith.constant 20 : index
    %26 = vector.load %arg1[%c0_25, %c20] : memref<8x1152xf32, #tpu.memory_space<vmem>>, vector<8x1024xf32>
    %c5 = arith.constant 5 : index
    %c0_26 = arith.constant 0 : index
    %c0_27 = arith.constant 0 : index
    %27 = vector.load %arg2[%c5, %c0_26, %c0_27] : memref<25x8x8xf32, #tpu.memory_space<vmem>>, vector<1x8x8xf32>
    %28 = vector.shape_cast %27 : vector<1x8x8xf32> to vector<8x8xf32>
    %cst_28 = arith.constant dense<0.000000e+00> : vector<8x1024xf32>
    %29 = tpu.matmul %28, %26, %cst_28 {dimension_numbers = #tpu.dot_dimension_numbers<[1], [0], [0], [1], [0, 0, 1, 1], [], []>} : vector<8x8xf32>, vector<8x1024xf32>, vector<8x1024xf32> -> vector<8x1024xf32>
    %30 = arith.addf %25, %29 : vector<8x1024xf32>
    %c0_29 = arith.constant 0 : index
    %c21 = arith.constant 21 : index
    %31 = vector.load %arg1[%c0_29, %c21] : memref<8x1152xf32, #tpu.memory_space<vmem>>, vector<8x1024xf32>
    %c6 = arith.constant 6 : index
    %c0_30 = arith.constant 0 : index
    %c0_31 = arith.constant 0 : index
    %32 = vector.load %arg2[%c6, %c0_30, %c0_31] : memref<25x8x8xf32, #tpu.memory_space<vmem>>, vector<1x8x8xf32>
    %33 = vector.shape_cast %32 : vector<1x8x8xf32> to vector<8x8xf32>
    %cst_32 = arith.constant dense<0.000000e+00> : vector<8x1024xf32>
    %34 = tpu.matmul %33, %31, %cst_32 {dimension_numbers = #tpu.dot_dimension_numbers<[1], [0], [0], [1], [0, 0, 1, 1], [], []>} : vector<8x8xf32>, vector<8x1024xf32>, vector<8x1024xf32> -> vector<8x1024xf32>
    %35 = arith.addf %30, %34 : vector<8x1024xf32>
    %c0_33 = arith.constant 0 : index
    %c22 = arith.constant 22 : index
    %36 = vector.load %arg1[%c0_33, %c22] : memref<8x1152xf32, #tpu.memory_space<vmem>>, vector<8x1024xf32>
    %c7 = arith.constant 7 : index
    %c0_34 = arith.constant 0 : index
    %c0_35 = arith.constant 0 : index
    %37 = vector.load %arg2[%c7, %c0_34, %c0_35] : memref<25x8x8xf32, #tpu.memory_space<vmem>>, vector<1x8x8xf32>
    %38 = vector.shape_cast %37 : vector<1x8x8xf32> to vector<8x8xf32>
    %cst_36 = arith.constant dense<0.000000e+00> : vector<8x1024xf32>
    %39 = tpu.matmul %38, %36, %cst_36 {dimension_numbers = #tpu.dot_dimension_numbers<[1], [0], [0], [1], [0, 0, 1, 1], [], []>} : vector<8x8xf32>, vector<8x1024xf32>, vector<8x1024xf32> -> vector<8x1024xf32>
    %40 = arith.addf %35, %39 : vector<8x1024xf32>
    %c0_37 = arith.constant 0 : index
    %c23 = arith.constant 23 : index
    %41 = vector.load %arg1[%c0_37, %c23] : memref<8x1152xf32, #tpu.memory_space<vmem>>, vector<8x1024xf32>
    %c8 = arith.constant 8 : index
    %c0_38 = arith.constant 0 : index
    %c0_39 = arith.constant 0 : index
    %42 = vector.load %arg2[%c8, %c0_38, %c0_39] : memref<25x8x8xf32, #tpu.memory_space<vmem>>, vector<1x8x8xf32>
    %43 = vector.shape_cast %42 : vector<1x8x8xf32> to vector<8x8xf32>
    %cst_40 = arith.constant dense<0.000000e+00> : vector<8x1024xf32>
    %44 = tpu.matmul %43, %41, %cst_40 {dimension_numbers = #tpu.dot_dimension_numbers<[1], [0], [0], [1], [0, 0, 1, 1], [], []>} : vector<8x8xf32>, vector<8x1024xf32>, vector<8x1024xf32> -> vector<8x1024xf32>
    %45 = arith.addf %40, %44 : vector<8x1024xf32>
    %c0_41 = arith.constant 0 : index
    %c24 = arith.constant 24 : index
    %46 = vector.load %arg1[%c0_41, %c24] : memref<8x1152xf32, #tpu.memory_space<vmem>>, vector<8x1024xf32>
    %c9 = arith.constant 9 : index
    %c0_42 = arith.constant 0 : index
    %c0_43 = arith.constant 0 : index
    %47 = vector.load %arg2[%c9, %c0_42, %c0_43] : memref<25x8x8xf32, #tpu.memory_space<vmem>>, vector<1x8x8xf32>
    %48 = vector.shape_cast %47 : vector<1x8x8xf32> to vector<8x8xf32>
    %cst_44 = arith.constant dense<0.000000e+00> : vector<8x1024xf32>
    %49 = tpu.matmul %48, %46, %cst_44 {dimension_numbers = #tpu.dot_dimension_numbers<[1], [0], [0], [1], [0, 0, 1, 1], [], []>} : vector<8x8xf32>, vector<8x1024xf32>, vector<8x1024xf32> -> vector<8x1024xf32>
    %50 = arith.addf %45, %49 : vector<8x1024xf32>
    %c0_45 = arith.constant 0 : index
    %c40 = arith.constant 40 : index
    %51 = vector.load %arg1[%c0_45, %c40] : memref<8x1152xf32, #tpu.memory_space<vmem>>, vector<8x1024xf32>
    %c10 = arith.constant 10 : index
    %c0_46 = arith.constant 0 : index
    %c0_47 = arith.constant 0 : index
    %52 = vector.load %arg2[%c10, %c0_46, %c0_47] : memref<25x8x8xf32, #tpu.memory_space<vmem>>, vector<1x8x8xf32>
    %53 = vector.shape_cast %52 : vector<1x8x8xf32> to vector<8x8xf32>
    %cst_48 = arith.constant dense<0.000000e+00> : vector<8x1024xf32>
    %54 = tpu.matmul %53, %51, %cst_48 {dimension_numbers = #tpu.dot_dimension_numbers<[1], [0], [0], [1], [0, 0, 1, 1], [], []>} : vector<8x8xf32>, vector<8x1024xf32>, vector<8x1024xf32> -> vector<8x1024xf32>
    %55 = arith.addf %50, %54 : vector<8x1024xf32>
    %c0_49 = arith.constant 0 : index
    %c41 = arith.constant 41 : index
    %56 = vector.load %arg1[%c0_49, %c41] : memref<8x1152xf32, #tpu.memory_space<vmem>>, vector<8x1024xf32>
    %c11 = arith.constant 11 : index
    %c0_50 = arith.constant 0 : index
    %c0_51 = arith.constant 0 : index
    %57 = vector.load %arg2[%c11, %c0_50, %c0_51] : memref<25x8x8xf32, #tpu.memory_space<vmem>>, vector<1x8x8xf32>
    %58 = vector.shape_cast %57 : vector<1x8x8xf32> to vector<8x8xf32>
    %cst_52 = arith.constant dense<0.000000e+00> : vector<8x1024xf32>
    %59 = tpu.matmul %58, %56, %cst_52 {dimension_numbers = #tpu.dot_dimension_numbers<[1], [0], [0], [1], [0, 0, 1, 1], [], []>} : vector<8x8xf32>, vector<8x1024xf32>, vector<8x1024xf32> -> vector<8x1024xf32>
    %60 = arith.addf %55, %59 : vector<8x1024xf32>
    %c0_53 = arith.constant 0 : index
    %c42 = arith.constant 42 : index
    %61 = vector.load %arg1[%c0_53, %c42] : memref<8x1152xf32, #tpu.memory_space<vmem>>, vector<8x1024xf32>
    %c12 = arith.constant 12 : index
    %c0_54 = arith.constant 0 : index
    %c0_55 = arith.constant 0 : index
    %62 = vector.load %arg2[%c12, %c0_54, %c0_55] : memref<25x8x8xf32, #tpu.memory_space<vmem>>, vector<1x8x8xf32>
    %63 = vector.shape_cast %62 : vector<1x8x8xf32> to vector<8x8xf32>
    %cst_56 = arith.constant dense<0.000000e+00> : vector<8x1024xf32>
    %64 = tpu.matmul %63, %61, %cst_56 {dimension_numbers = #tpu.dot_dimension_numbers<[1], [0], [0], [1], [0, 0, 1, 1], [], []>} : vector<8x8xf32>, vector<8x1024xf32>, vector<8x1024xf32> -> vector<8x1024xf32>
    %65 = arith.addf %60, %64 : vector<8x1024xf32>
    %c0_57 = arith.constant 0 : index
    %c43 = arith.constant 43 : index
    %66 = vector.load %arg1[%c0_57, %c43] : memref<8x1152xf32, #tpu.memory_space<vmem>>, vector<8x1024xf32>
    %c13 = arith.constant 13 : index
    %c0_58 = arith.constant 0 : index
    %c0_59 = arith.constant 0 : index
    %67 = vector.load %arg2[%c13, %c0_58, %c0_59] : memref<25x8x8xf32, #tpu.memory_space<vmem>>, vector<1x8x8xf32>
    %68 = vector.shape_cast %67 : vector<1x8x8xf32> to vector<8x8xf32>
    %cst_60 = arith.constant dense<0.000000e+00> : vector<8x1024xf32>
    %69 = tpu.matmul %68, %66, %cst_60 {dimension_numbers = #tpu.dot_dimension_numbers<[1], [0], [0], [1], [0, 0, 1, 1], [], []>} : vector<8x8xf32>, vector<8x1024xf32>, vector<8x1024xf32> -> vector<8x1024xf32>
    %70 = arith.addf %65, %69 : vector<8x1024xf32>
    %c0_61 = arith.constant 0 : index
    %c44 = arith.constant 44 : index
    %71 = vector.load %arg1[%c0_61, %c44] : memref<8x1152xf32, #tpu.memory_space<vmem>>, vector<8x1024xf32>
    %c14 = arith.constant 14 : index
    %c0_62 = arith.constant 0 : index
    %c0_63 = arith.constant 0 : index
    %72 = vector.load %arg2[%c14, %c0_62, %c0_63] : memref<25x8x8xf32, #tpu.memory_space<vmem>>, vector<1x8x8xf32>
    %73 = vector.shape_cast %72 : vector<1x8x8xf32> to vector<8x8xf32>
    %cst_64 = arith.constant dense<0.000000e+00> : vector<8x1024xf32>
    %74 = tpu.matmul %73, %71, %cst_64 {dimension_numbers = #tpu.dot_dimension_numbers<[1], [0], [0], [1], [0, 0, 1, 1], [], []>} : vector<8x8xf32>, vector<8x1024xf32>, vector<8x1024xf32> -> vector<8x1024xf32>
    %75 = arith.addf %70, %74 : vector<8x1024xf32>
    %c0_65 = arith.constant 0 : index
    %c60 = arith.constant 60 : index
    %76 = vector.load %arg1[%c0_65, %c60] : memref<8x1152xf32, #tpu.memory_space<vmem>>, vector<8x1024xf32>
    %c15 = arith.constant 15 : index
    %c0_66 = arith.constant 0 : index
    %c0_67 = arith.constant 0 : index
    %77 = vector.load %arg2[%c15, %c0_66, %c0_67] : memref<25x8x8xf32, #tpu.memory_space<vmem>>, vector<1x8x8xf32>
    %78 = vector.shape_cast %77 : vector<1x8x8xf32> to vector<8x8xf32>
    %cst_68 = arith.constant dense<0.000000e+00> : vector<8x1024xf32>
    %79 = tpu.matmul %78, %76, %cst_68 {dimension_numbers = #tpu.dot_dimension_numbers<[1], [0], [0], [1], [0, 0, 1, 1], [], []>} : vector<8x8xf32>, vector<8x1024xf32>, vector<8x1024xf32> -> vector<8x1024xf32>
    %80 = arith.addf %75, %79 : vector<8x1024xf32>
    %c0_69 = arith.constant 0 : index
    %c61 = arith.constant 61 : index
    %81 = vector.load %arg1[%c0_69, %c61] : memref<8x1152xf32, #tpu.memory_space<vmem>>, vector<8x1024xf32>
    %c16 = arith.constant 16 : index
    %c0_70 = arith.constant 0 : index
    %c0_71 = arith.constant 0 : index
    %82 = vector.load %arg2[%c16, %c0_70, %c0_71] : memref<25x8x8xf32, #tpu.memory_space<vmem>>, vector<1x8x8xf32>
    %83 = vector.shape_cast %82 : vector<1x8x8xf32> to vector<8x8xf32>
    %cst_72 = arith.constant dense<0.000000e+00> : vector<8x1024xf32>
    %84 = tpu.matmul %83, %81, %cst_72 {dimension_numbers = #tpu.dot_dimension_numbers<[1], [0], [0], [1], [0, 0, 1, 1], [], []>} : vector<8x8xf32>, vector<8x1024xf32>, vector<8x1024xf32> -> vector<8x1024xf32>
    %85 = arith.addf %80, %84 : vector<8x1024xf32>
    %c0_73 = arith.constant 0 : index
    %c62 = arith.constant 62 : index
    %86 = vector.load %arg1[%c0_73, %c62] : memref<8x1152xf32, #tpu.memory_space<vmem>>, vector<8x1024xf32>
    %c17 = arith.constant 17 : index
    %c0_74 = arith.constant 0 : index
    %c0_75 = arith.constant 0 : index
    %87 = vector.load %arg2[%c17, %c0_74, %c0_75] : memref<25x8x8xf32, #tpu.memory_space<vmem>>, vector<1x8x8xf32>
    %88 = vector.shape_cast %87 : vector<1x8x8xf32> to vector<8x8xf32>
    %cst_76 = arith.constant dense<0.000000e+00> : vector<8x1024xf32>
    %89 = tpu.matmul %88, %86, %cst_76 {dimension_numbers = #tpu.dot_dimension_numbers<[1], [0], [0], [1], [0, 0, 1, 1], [], []>} : vector<8x8xf32>, vector<8x1024xf32>, vector<8x1024xf32> -> vector<8x1024xf32>
    %90 = arith.addf %85, %89 : vector<8x1024xf32>
    %c0_77 = arith.constant 0 : index
    %c63 = arith.constant 63 : index
    %91 = vector.load %arg1[%c0_77, %c63] : memref<8x1152xf32, #tpu.memory_space<vmem>>, vector<8x1024xf32>
    %c18 = arith.constant 18 : index
    %c0_78 = arith.constant 0 : index
    %c0_79 = arith.constant 0 : index
    %92 = vector.load %arg2[%c18, %c0_78, %c0_79] : memref<25x8x8xf32, #tpu.memory_space<vmem>>, vector<1x8x8xf32>
    %93 = vector.shape_cast %92 : vector<1x8x8xf32> to vector<8x8xf32>
    %cst_80 = arith.constant dense<0.000000e+00> : vector<8x1024xf32>
    %94 = tpu.matmul %93, %91, %cst_80 {dimension_numbers = #tpu.dot_dimension_numbers<[1], [0], [0], [1], [0, 0, 1, 1], [], []>} : vector<8x8xf32>, vector<8x1024xf32>, vector<8x1024xf32> -> vector<8x1024xf32>
    %95 = arith.addf %90, %94 : vector<8x1024xf32>
    %c0_81 = arith.constant 0 : index
    %c64 = arith.constant 64 : index
    %96 = vector.load %arg1[%c0_81, %c64] : memref<8x1152xf32, #tpu.memory_space<vmem>>, vector<8x1024xf32>
    %c19 = arith.constant 19 : index
    %c0_82 = arith.constant 0 : index
    %c0_83 = arith.constant 0 : index
    %97 = vector.load %arg2[%c19, %c0_82, %c0_83] : memref<25x8x8xf32, #tpu.memory_space<vmem>>, vector<1x8x8xf32>
    %98 = vector.shape_cast %97 : vector<1x8x8xf32> to vector<8x8xf32>
    %cst_84 = arith.constant dense<0.000000e+00> : vector<8x1024xf32>
    %99 = tpu.matmul %98, %96, %cst_84 {dimension_numbers = #tpu.dot_dimension_numbers<[1], [0], [0], [1], [0, 0, 1, 1], [], []>} : vector<8x8xf32>, vector<8x1024xf32>, vector<8x1024xf32> -> vector<8x1024xf32>
    %100 = arith.addf %95, %99 : vector<8x1024xf32>
    %c0_85 = arith.constant 0 : index
    %c80 = arith.constant 80 : index
    %101 = vector.load %arg1[%c0_85, %c80] : memref<8x1152xf32, #tpu.memory_space<vmem>>, vector<8x1024xf32>
    %c20_86 = arith.constant 20 : index
    %c0_87 = arith.constant 0 : index
    %c0_88 = arith.constant 0 : index
    %102 = vector.load %arg2[%c20_86, %c0_87, %c0_88] : memref<25x8x8xf32, #tpu.memory_space<vmem>>, vector<1x8x8xf32>
    %103 = vector.shape_cast %102 : vector<1x8x8xf32> to vector<8x8xf32>
    %cst_89 = arith.constant dense<0.000000e+00> : vector<8x1024xf32>
    %104 = tpu.matmul %103, %101, %cst_89 {dimension_numbers = #tpu.dot_dimension_numbers<[1], [0], [0], [1], [0, 0, 1, 1], [], []>} : vector<8x8xf32>, vector<8x1024xf32>, vector<8x1024xf32> -> vector<8x1024xf32>
    %105 = arith.addf %100, %104 : vector<8x1024xf32>
    %c0_90 = arith.constant 0 : index
    %c81 = arith.constant 81 : index
    %106 = vector.load %arg1[%c0_90, %c81] : memref<8x1152xf32, #tpu.memory_space<vmem>>, vector<8x1024xf32>
    %c21_91 = arith.constant 21 : index
    %c0_92 = arith.constant 0 : index
    %c0_93 = arith.constant 0 : index
    %107 = vector.load %arg2[%c21_91, %c0_92, %c0_93] : memref<25x8x8xf32, #tpu.memory_space<vmem>>, vector<1x8x8xf32>
    %108 = vector.shape_cast %107 : vector<1x8x8xf32> to vector<8x8xf32>
    %cst_94 = arith.constant dense<0.000000e+00> : vector<8x1024xf32>
    %109 = tpu.matmul %108, %106, %cst_94 {dimension_numbers = #tpu.dot_dimension_numbers<[1], [0], [0], [1], [0, 0, 1, 1], [], []>} : vector<8x8xf32>, vector<8x1024xf32>, vector<8x1024xf32> -> vector<8x1024xf32>
    %110 = arith.addf %105, %109 : vector<8x1024xf32>
    %c0_95 = arith.constant 0 : index
    %c82 = arith.constant 82 : index
    %111 = vector.load %arg1[%c0_95, %c82] : memref<8x1152xf32, #tpu.memory_space<vmem>>, vector<8x1024xf32>
    %c22_96 = arith.constant 22 : index
    %c0_97 = arith.constant 0 : index
    %c0_98 = arith.constant 0 : index
    %112 = vector.load %arg2[%c22_96, %c0_97, %c0_98] : memref<25x8x8xf32, #tpu.memory_space<vmem>>, vector<1x8x8xf32>
    %113 = vector.shape_cast %112 : vector<1x8x8xf32> to vector<8x8xf32>
    %cst_99 = arith.constant dense<0.000000e+00> : vector<8x1024xf32>
    %114 = tpu.matmul %113, %111, %cst_99 {dimension_numbers = #tpu.dot_dimension_numbers<[1], [0], [0], [1], [0, 0, 1, 1], [], []>} : vector<8x8xf32>, vector<8x1024xf32>, vector<8x1024xf32> -> vector<8x1024xf32>
    %115 = arith.addf %110, %114 : vector<8x1024xf32>
    %c0_100 = arith.constant 0 : index
    %c83 = arith.constant 83 : index
    %116 = vector.load %arg1[%c0_100, %c83] : memref<8x1152xf32, #tpu.memory_space<vmem>>, vector<8x1024xf32>
    %c23_101 = arith.constant 23 : index
    %c0_102 = arith.constant 0 : index
    %c0_103 = arith.constant 0 : index
    %117 = vector.load %arg2[%c23_101, %c0_102, %c0_103] : memref<25x8x8xf32, #tpu.memory_space<vmem>>, vector<1x8x8xf32>
    %118 = vector.shape_cast %117 : vector<1x8x8xf32> to vector<8x8xf32>
    %cst_104 = arith.constant dense<0.000000e+00> : vector<8x1024xf32>
    %119 = tpu.matmul %118, %116, %cst_104 {dimension_numbers = #tpu.dot_dimension_numbers<[1], [0], [0], [1], [0, 0, 1, 1], [], []>} : vector<8x8xf32>, vector<8x1024xf32>, vector<8x1024xf32> -> vector<8x1024xf32>
    %120 = arith.addf %115, %119 : vector<8x1024xf32>
    %c0_105 = arith.constant 0 : index
    %c84 = arith.constant 84 : index
    %121 = vector.load %arg1[%c0_105, %c84] : memref<8x1152xf32, #tpu.memory_space<vmem>>, vector<8x1024xf32>
    %c24_106 = arith.constant 24 : index
    %c0_107 = arith.constant 0 : index
    %c0_108 = arith.constant 0 : index
    %122 = vector.load %arg2[%c24_106, %c0_107, %c0_108] : memref<25x8x8xf32, #tpu.memory_space<vmem>>, vector<1x8x8xf32>
    %123 = vector.shape_cast %122 : vector<1x8x8xf32> to vector<8x8xf32>
    %cst_109 = arith.constant dense<0.000000e+00> : vector<8x1024xf32>
    %124 = tpu.matmul %123, %121, %cst_109 {dimension_numbers = #tpu.dot_dimension_numbers<[1], [0], [0], [1], [0, 0, 1, 1], [], []>} : vector<8x8xf32>, vector<8x1024xf32>, vector<8x1024xf32> -> vector<8x1024xf32>
    %125 = arith.addf %120, %124 : vector<8x1024xf32>
    %c0_110 = arith.constant 0 : index
    %c0_111 = arith.constant 0 : index
    %126 = vector.load %arg3[%c0_110, %c0_111] : memref<8x3xf32, #tpu.memory_space<vmem>>, vector<8x1xf32>
    %c0_112 = arith.constant 0 : index
    %c1_113 = arith.constant 1 : index
    %127 = vector.load %arg3[%c0_112, %c1_113] : memref<8x3xf32, #tpu.memory_space<vmem>>, vector<8x1xf32>
    %c0_114 = arith.constant 0 : index
    %c2_115 = arith.constant 2 : index
    %128 = vector.load %arg3[%c0_114, %c2_115] : memref<8x3xf32, #tpu.memory_space<vmem>>, vector<8x1xf32>
    %129 = vector.broadcast %126 : vector<8x1xf32> to vector<8x1024xf32>
    %130 = arith.addf %125, %129 : vector<8x1024xf32>
    %c0_116 = arith.constant 0 : index
    %c0_117 = arith.constant 0 : index
    %131 = vector.load %arg4[%c0_116, %c0_117] : memref<1x1024xf32, #tpu.memory_space<vmem>>, vector<1x1024xf32>
    %132 = vector.broadcast %131 : vector<1x1024xf32> to vector<8x1024xf32>
    %133 = arith.mulf %130, %132 : vector<8x1024xf32>
    %cst_118 = arith.constant dense<0.000000e+00> : vector<8xf32>
    %134 = vector.multi_reduction <add>, %133, %cst_118 [1] : vector<8x1024xf32> to vector<8xf32>
    %135 = vector.shape_cast %134 : vector<8xf32> to vector<8x1xf32>
    %cst_119 = arith.constant 0.001953125 : f32
    %136 = vector.broadcast %cst_119 : f32 to vector<8x1xf32>
    %137 = arith.mulf %135, %136 : vector<8x1xf32>
    %138 = arith.mulf %133, %130 : vector<8x1024xf32>
    %cst_120 = arith.constant dense<0.000000e+00> : vector<8xf32>
    %139 = vector.multi_reduction <add>, %138, %cst_120 [1] : vector<8x1024xf32> to vector<8xf32>
    %140 = vector.shape_cast %139 : vector<8xf32> to vector<8x1xf32>
    %cst_121 = arith.constant 0.001953125 : f32
    %141 = vector.broadcast %cst_121 : f32 to vector<8x1xf32>
    %142 = arith.mulf %140, %141 : vector<8x1xf32>
    %143 = arith.mulf %137, %137 : vector<8x1xf32>
    %144 = arith.subf %142, %143 : vector<8x1xf32>
    %145 = vector.broadcast %137 : vector<8x1xf32> to vector<8x1024xf32>
    %146 = arith.subf %130, %145 : vector<8x1024xf32>
    %cst_122 = arith.constant 9.99999974E-6 : f32
    %147 = vector.broadcast %cst_122 : f32 to vector<8x1xf32>
    %148 = arith.addf %144, %147 : vector<8x1xf32>
    %149 = math.rsqrt %148 : vector<8x1xf32>
    %150 = vector.broadcast %149 : vector<8x1xf32> to vector<8x1024xf32>
    %151 = arith.mulf %146, %150 : vector<8x1024xf32>
    %152 = vector.broadcast %127 : vector<8x1xf32> to vector<8x1024xf32>
    %153 = arith.mulf %151, %152 : vector<8x1024xf32>
    %154 = vector.broadcast %128 : vector<8x1xf32> to vector<8x1024xf32>
    %155 = arith.addf %153, %154 : vector<8x1024xf32>
    %cst_123 = arith.constant 0.000000e+00 : f32
    %156 = vector.broadcast %cst_123 : f32 to vector<8x1024xf32>
    %157 = arith.maximumf %155, %156 : vector<8x1024xf32>
    %c0_124 = arith.constant 0 : index
    %c0_125 = arith.constant 0 : index
    %158 = vector.load %arg5[%c0_124, %c0_125] : memref<8x1024xf32, #tpu.memory_space<vmem>>, vector<8x1024xf32>
    tpu.vector_store %arg5[%c0_124, %c0_125], %157 {strides = array<i32>} : memref<8x1024xf32, #tpu.memory_space<vmem>>, vector<8x1024xf32>,
    return
  }
  func.func @transform_0(%arg0: i32) -> (i32, i32) {
    %c0_i32 = arith.constant 0 : i32
    %c0_i32_0 = arith.constant 0 : i32
    %c0_i32_1 = arith.constant 0 : i32
    return %c0_i32, %c0_i32_0 : i32, i32
  }
  func.func @transform_1(%arg0: i32) -> (i32, i32, i32) {
    %c0_i32 = arith.constant 0 : i32
    %c0_i32_0 = arith.constant 0 : i32
    %c0_i32_1 = arith.constant 0 : i32
    %c0_i32_2 = arith.constant 0 : i32
    return %c0_i32, %c0_i32_0, %c0_i32_1 : i32, i32, i32
  }
  func.func @transform_2(%arg0: i32) -> (i32, i32) {
    %c0_i32 = arith.constant 0 : i32
    %c0_i32_0 = arith.constant 0 : i32
    %c0_i32_1 = arith.constant 0 : i32
    return %c0_i32, %c0_i32_0 : i32, i32
  }
  func.func @transform_3(%arg0: i32) -> (i32, i32) {
    %c0_i32 = arith.constant 0 : i32
    %c0_i32_0 = arith.constant 0 : i32
    %c0_i32_1 = arith.constant 0 : i32
    return %c0_i32, %c0_i32_0 : i32, i32
  }
  func.func @transform_4(%arg0: i32) -> (i32, i32) {
    %c0_i32 = arith.constant 0 : i32
    %c0_i32_0 = arith.constant 0 : i32
    %c0_i32_1 = arith.constant 0 : i32
    return %c0_i32, %c0_i32_0 : i32, i32
  }
}

</mosaic_0001>

<bundles_post_ra>
// kernel: tpu_custom_call.1
= control target key start
LH: loop header
LB: loop body
LE: loop exit
PB: predicated region body
PF: predicated region fallthrough
CT: control target
= control target key end

     0   :  { %s8842_s19 = smov 127   ;;  %v8843_v4 = vmov 0.0   ;;  %s9873_s0 = inlined_call_operand.vmem [shape: f32[8,1152], index: 0, kind: input, shape index: {}]   ;;  %s9874_s1 = inlined_call_operand.vmem [shape: f32[25,8,8], index: 1, kind: input, shape index: {}]   ;;  %s9875_s2 = inlined_call_operand.vmem [shape: f32[8,3], index: 2, kind: input, shape index: {}]   ;;  %s9876_s3 = inlined_call_operand.vmem [shape: f32[1,1024], index: 3, kind: input, shape index: {}]   ;;  %s9877_s4 = inlined_call_operand.hbm [shape: f32[8,1024], index: 4, kind: output, shape index: {}]  }
   0x1   :  { %v8899_v0 = vld [vmem:[%s9873_s0 + $0x8] sm:$0xff]  ;;  %v8904_v1 = vld [vmem:[%s9873_s0] sm:$0xff]  ;;  %v8911_v2 = vld [vmem:[%s9873_s0 + $0x10] sm:$0xff]  ;;  %150 = vmatprep.mubr.f32.mxu0 %v8843_v4  ;;  %221 = vmatprep.mubr.f32.mxu1 %v8843_v4 }
   0x2   :  { %49 = vrot.lane.b32.xlu0 %v8899_v0, %s8842_s19  ;;  %47 = vrot.lane.b32.xlu1 %v8904_v1, %s8842_s19  ;;  %v8916_v3 = vld [vmem:[%s9873_s0 + $0x18] sm:$0xff] }
   0x3   :  { %9 = vsyncpa [#allocation3], 0  ;;  %v8925_v5 = vld [vmem:[%s9873_s0 + $0x20] sm:$0xff]  ;;  %v8930_v6 = vld [vmem:[%s9873_s0 + $0x28] sm:$0xff]  ;;  %s8844_s8 = smov 126   ;;  %s8845_s9 = smov 125  }
   0x4   :  { %v8937_v7 = vld [vmem:[%s9873_s0 + $0x30] sm:$0xff]  ;;  %v8942_v8 = vld [vmem:[%s9873_s0 + $0x38] sm:$0xff]  ;;  %v8949_v9 = vld [vmem:[%s9873_s0 + $0x40] sm:$0xff]  ;;  %s8846_s10 = smov 124   ;;  %s8847_s11 = smov 108   ;;  %vm65_vm0 = vcmask 1039360  }
   0x5   :  { %s8848_s12 = smov 107   ;;  %s8849_s13 = smov 106   ;;  %v8459_v15 = vld [vmem:[%s9874_s1 + $0x8] sm:$0xff]  ;;  %vm82_vm1 = vcmask 64512   ;;  %v26_v28 = vld [vmem:[%s9874_s1] sm:$0xff]  ;;  %vm677_vm2 = vcmask 1031168  }
   0x6   :  { %51 = vrot.lane.b32.xlu0 %v8911_v2, %s8842_s19  ;;  %53 = vrot.lane.b32.xlu1 %v8916_v3, %s8842_s19  ;;  %s8850_s16 = smov 105   ;;  %v8468_v41 = vld [vmem:[%s9874_s1 + $0x10] sm:$0xff]  ;;  %s8851_s21 = smov 104   ;;  %vm1009_vm3 = vcmask 1022976   ;;  %v8473_v52 = vld [vmem:[%s9874_s1 + $0x18] sm:$0xff]  ;;  %vm1341_vm4 = vcmask 1014784  }
   0x7   :  { %s8852_s24 = smov 88   ;;  %s8853_s27 = smov 87   ;;  %vm1673_vm5 = vcmask 883712   ;;  %vm2005_vm6 = vcmask 875520   ;;  %vm2337_vm7 = vcmask 867328   ;;  %vm2669_vm8 = vcmask 859136  }
   0x8   :  { %s8854_s30 = smov 86   ;;  %s8855_s7 = smov 85   ;;  %vm3001_vm9 = vcmask 850944   ;;  %vm3333_vm10 = vcmask 719872   ;;  %vm3665_vm11 = vcmask 711680   ;;  %vm3997_vm12 = vcmask 703488  }
   0x9   :  { %s8860_s14 = smov 65   ;;  %vm4329_vm13 = vcmask 695296   ;;  %vm4661_vm14 = vcmask 687104   ;;  %s8863_s22 = smov 47   ;;  %vm4993_vm15 = vcmask 556032  }
   0xa   :  { %55 = vrot.lane.b32.xlu0 %v8925_v5, %s8842_s19  ;;  %57 = vrot.lane.b32.xlu1 %v8930_v6, %s8842_s19  ;;  %s8864_s25 = smov 46   ;;  %s8865_s28 = smov 45  }
   0xb   :  { %s8866_s5 = smov 44  }
   0xe   :  { %59 = vrot.lane.b32.xlu0 %v8937_v7, %s8842_s19  ;;  %61 = vrot.lane.b32.xlu1 %v8942_v8, %s8842_s19 }
  0x12   :  { %63 = vrot.lane.b32.xlu0 %v8949_v9, %s8842_s19  ;;  %661 = vrot.lane.b32.xlu1 %v8899_v0, %s8844_s8  ;;  %s8862_s19 = smov 48  }
  0x16   :  { %663 = vrot.lane.b32.xlu0 %v8911_v2, %s8844_s8  ;;  %659 = vrot.lane.b32.xlu1 %v8904_v1, %s8844_s8 }
  0x1a   :  { %665 = vrot.lane.b32.xlu0 %v8916_v3, %s8844_s8  ;;  %667 = vrot.lane.b32.xlu1 %v8925_v5, %s8844_s8 }
  0x1e   :  { %669 = vrot.lane.b32.xlu0 %v8930_v6, %s8844_s8  ;;  %671 = vrot.lane.b32.xlu1 %v8937_v7, %s8844_s8 }
  0x22   :  { %673 = vrot.lane.b32.xlu0 %v8942_v8, %s8844_s8  ;;  %675 = vrot.lane.b32.xlu1 %v8949_v9, %s8844_s8 }
  0x26   :  { %993 = vrot.lane.b32.xlu0 %v8899_v0, %s8845_s9  ;;  %995 = vrot.lane.b32.xlu1 %v8911_v2, %s8845_s9 }
  0x2a   :  { %991 = vrot.lane.b32.xlu0 %v8904_v1, %s8845_s9  ;;  %997 = vrot.lane.b32.xlu1 %v8916_v3, %s8845_s9 }
  0x2e   :  { %999 = vrot.lane.b32.xlu0 %v8925_v5, %s8845_s9  ;;  %1001 = vrot.lane.b32.xlu1 %v8930_v6, %s8845_s9 }
  0x32   :  { %1003 = vrot.lane.b32.xlu0 %v8937_v7, %s8845_s9  ;;  %1005 = vrot.lane.b32.xlu1 %v8942_v8, %s8845_s9 }
  0x36   :  { %1007 = vrot.lane.b32.xlu0 %v8949_v9, %s8845_s9  ;;  %1325 = vrot.lane.b32.xlu1 %v8899_v0, %s8846_s10 }
  0x3a   :  { %1327 = vrot.lane.b32.xlu0 %v8911_v2, %s8846_s10  ;;  %1323 = vrot.lane.b32.xlu1 %v8904_v1, %s8846_s10 }
  0x3e   :  { %1329 = vrot.lane.b32.xlu0 %v8916_v3, %s8846_s10  ;;  %1331 = vrot.lane.b32.xlu1 %v8925_v5, %s8846_s10 }
  0x42   :  { %1333 = vrot.lane.b32.xlu0 %v8930_v6, %s8846_s10  ;;  %1335 = vrot.lane.b32.xlu1 %v8937_v7, %s8846_s10 }
  0x46   :  { %1337 = vrot.lane.b32.xlu0 %v8942_v8, %s8846_s10  ;;  %1339 = vrot.lane.b32.xlu1 %v8949_v9, %s8846_s10  ;;  %s8856_s10 = smov 84  }
  0x4a   :  { %1657 = vrot.lane.b32.xlu0 %v8899_v0, %s8847_s11  ;;  %1659 = vrot.lane.b32.xlu1 %v8911_v2, %s8847_s11 }
  0x4e   :  { %1655 = vrot.lane.b32.xlu0 %v8904_v1, %s8847_s11  ;;  %1661 = vrot.lane.b32.xlu1 %v8916_v3, %s8847_s11 }
  0x52   :  { %1663 = vrot.lane.b32.xlu0 %v8925_v5, %s8847_s11  ;;  %1665 = vrot.lane.b32.xlu1 %v8930_v6, %s8847_s11 }
  0x56   :  { %1667 = vrot.lane.b32.xlu0 %v8937_v7, %s8847_s11  ;;  %1669 = vrot.lane.b32.xlu1 %v8942_v8, %s8847_s11 }
  0x5a   :  { %1671 = vrot.lane.b32.xlu0 %v8949_v9, %s8847_s11  ;;  %1989 = vrot.lane.b32.xlu1 %v8899_v0, %s8848_s12 }
  0x5e   :  { %1991 = vrot.lane.b32.xlu0 %v8911_v2, %s8848_s12  ;;  %1987 = vrot.lane.b32.xlu1 %v8904_v1, %s8848_s12 }
  0x62   :  { %1993 = vrot.lane.b32.xlu0 %v8916_v3, %s8848_s12  ;;  %1995 = vrot.lane.b32.xlu1 %v8925_v5, %s8848_s12 }
  0x66   :  { %1997 = vrot.lane.b32.xlu0 %v8930_v6, %s8848_s12  ;;  %1999 = vrot.lane.b32.xlu1 %v8937_v7, %s8848_s12 }
  0x6a   :  { %2001 = vrot.lane.b32.xlu0 %v8942_v8, %s8848_s12  ;;  %2003 = vrot.lane.b32.xlu1 %v8949_v9, %s8848_s12 }
  0x6e   :  { %2321 = vrot.lane.b32.xlu0 %v8899_v0, %s8849_s13  ;;  %2323 = vrot.lane.b32.xlu1 %v8911_v2, %s8849_s13 }
  0x72   :  { %2319 = vrot.lane.b32.xlu0 %v8904_v1, %s8849_s13  ;;  %2325 = vrot.lane.b32.xlu1 %v8916_v3, %s8849_s13 }
  0x74   :  { %v50_v10 = vpop.permute.xlu0 %49  ;;  %v48_v11 = vpop.permute.xlu1 %47 }
  0x75   :  { %v66_v16 = vsel %vm65_vm0, %v48_v11, %v50_v10 }
  0x76   :  { %2327 = vrot.lane.b32.xlu0 %v8925_v5, %s8849_s13  ;;  %2329 = vrot.lane.b32.xlu1 %v8930_v6, %s8849_s13 }
  0x78   :  { %v52_v12 = vpop.permute.xlu0 %51  ;;  %v54_v13 = vpop.permute.xlu1 %53 }
  0x79   :  { %v67_v14 = vsel %vm65_vm0, %v50_v10, %v52_v12  ;;  %v68_v20 = vsel %vm65_vm0, %v52_v12, %v54_v13 }
  0x7a   :  { %86 = vmatprep.subr.mxu0 %v67_v14  ;;  %2331 = vrot.lane.b32.xlu0 %v8937_v7, %s8849_s13 }
  0x7b   :  { %2333 = vrot.lane.b32.xlu1 %v8942_v8, %s8849_s13  ;;  %87 = vmatpush1.msra.mxu0 %v66_v16  ;;  %v8478_v16 = vld [vmem:[%s9874_s1 + $0x20] sm:$0xff] }
  0x7c   :  { %v56_v17 = vpop.permute.xlu0 %55  ;;  %v58_v18 = vpop.permute.xlu1 %57  ;;  %8460 = vmatmul.mubr.msk.f32.vlgmr.msra.gmra.mrb[0].mxu0 %vm82_vm1, %v8459_v15 }
  0x7d   :  { %v69_v19 = vsel %vm65_vm0, %v54_v13, %v56_v17  ;;  %292 = vmatprep.mubr.f32.mxu0 %v8843_v4  ;;  %v70_v24 = vsel %vm65_vm0, %v56_v17, %v58_v18 }
  0x7e   :  { %2335 = vrot.lane.b32.xlu0 %v8949_v9, %s8849_s13  ;;  %157 = vmatprep.subr.mxu1 %v69_v19  ;;  %s8857_s13 = smov 68  }
  0x7f   :  { %2653 = vrot.lane.b32.xlu1 %v8899_v0, %s8850_s16  ;;  %158 = vmatpush1.msra.mxu1 %v68_v20 }
  0x80   :  { %v60_v21 = vpop.permute.xlu0 %59  ;;  %v62_v22 = vpop.permute.xlu1 %61  ;;  %8461 = vmatmul.mubr.msk.f32.vlgmr.msra.gmra.mrb[0].mxu1 %vm82_vm1, %v8459_v15 }
  0x81   :  { %v71_v23 = vsel %vm65_vm0, %v58_v18, %v60_v21  ;;  %363 = vmatprep.mubr.f32.mxu1 %v8843_v4  ;;  %v72_v29 = vsel %vm65_vm0, %v60_v21, %v62_v22 }
  0x82   :  { %2655 = vrot.lane.b32.xlu0 %v8911_v2, %s8850_s16  ;;  %228 = vmatprep.subr.mxu0 %v71_v23 }
  0x83   :  { %2651 = vrot.lane.b32.xlu1 %v8904_v1, %s8850_s16  ;;  %229 = vmatpush1.msra.mxu0 %v70_v24 }
  0x84   :  { %v64_v25 = vpop.permute.xlu0 %63  ;;  %8462 = vmatmul.mubr.msk.f32.vlgmr.msra.gmra.mrb[2].mxu0 %vm82_vm1, %v8459_v15  ;;  %v662_v26 = vpop.permute.xlu1 %661  ;;  %373 = vmatprep.subr.mxu0 %v8899_v0 }
  0x85   :  { %v73_v27 = vsel %vm65_vm0, %v62_v22, %v64_v25  ;;  %374 = vmatpush1.msra.mxu0 %v8904_v1  ;;  %437 = vmatprep.mubr.f32.mxu0 %v8843_v4  ;;  %vm5325_vm0 = vcmask 547840  }
  0x86   :  { %2657 = vrot.lane.b32.xlu0 %v8916_v3, %s8850_s16  ;;  %299 = vmatprep.subr.mxu1 %v73_v27 }
  0x87   :  { %2659 = vrot.lane.b32.xlu1 %v8925_v5, %s8850_s16  ;;  %300 = vmatpush1.msra.mxu1 %v72_v29 }
  0x88   :  { %v664_v30 = vpop.permute.xlu0 %663  ;;  %8463 = vmatmul.mubr.msk.f32.vlgmr.msra.gmra.mrb[2].mxu1 %vm82_vm1, %v8459_v15  ;;  %v660_v31 = vpop.permute.xlu1 %659  ;;  %8464 = vmatmul.mubr.msk.f32.vlgmr.msra.gmra.mrb[0].mxu0 %vm82_vm1, %v26_v28 }
  0x89   :  { %515 = vmatprep.subr.mxu0 %v8930_v6  ;;  %444 = vmatprep.subr.mxu1 %v8916_v3  ;;  %v679_v32 = vsel %vm677_vm2, %v662_v26, %v664_v30  ;;  %v678_v35 = vsel %vm677_vm2, %v660_v31, %v662_v26 }
  0x8a   :  { %516 = vmatpush1.msra.mxu0 %v8925_v5  ;;  %2661 = vrot.lane.b32.xlu0 %v8930_v6, %s8850_s16 }
  0x8b   :  { %2663 = vrot.lane.b32.xlu1 %v8937_v7, %s8850_s16  ;;  %697 = vmatprep.subr.mxu0 %v679_v32 }
  0x8c   :  { %445 = vmatpush1.msra.mxu1 %v8911_v2  ;;  %508 = vmatprep.mubr.f32.mxu1 %v8843_v4  ;;  %v666_v33 = vpop.permute.xlu0 %665  ;;  %v668_v34 = vpop.permute.xlu1 %667 }
  0x8d   :  { %579 = vmatprep.mubr.f32.mxu0 %v8843_v4  ;;  %8465 = vmatmul.mubr.msk.f32.vlgmr.msra.gmra.mrb[0].mxu1 %vm82_vm1, %v26_v28  ;;  %v681_v36 = vsel %vm677_vm2, %v666_v33, %v668_v34  ;;  %v680_v40 = vsel %vm677_vm2, %v664_v30, %v666_v33 }
  0x8e   :  { %8466 = vmatmul.mubr.msk.f32.vlgmr.msra.gmra.mrb[2].mxu0 %vm82_vm1, %v26_v28  ;;  %586 = vmatprep.subr.mxu1 %v8942_v8 }
  0x8f   :  { %698 = vmatpush1.msra.mxu0 %v678_v35  ;;  %587 = vmatpush1.msra.mxu1 %v8937_v7 }
  0x90   :  { %2665 = vrot.lane.b32.xlu0 %v8942_v8, %s8850_s16  ;;  %2667 = vrot.lane.b32.xlu1 %v8949_v9, %s8850_s16  ;;  %v670_v37 = vpop.permute.xlu0 %669  ;;  %v672_v38 = vpop.permute.xlu1 %671  ;;  %s8858_s16 = smov 67  }
  0x91   :  { %768 = vmatprep.subr.mxu1 %v681_v36  ;;  %650 = vmatprep.mubr.f32.mxu1 %v8843_v4  ;;  %v683_v39 = vsel %vm677_vm2, %v670_v37, %v672_v38  ;;  %v682_v42 = vsel %vm677_vm2, %v668_v34, %v670_v37  ;;  %v8483_v34 = vld [vmem:[%s9874_s1 + $0x28] sm:$0xff] }
  0x92   :  { %8467 = vmatmul.mubr.msk.f32.vlgmr.msra.gmra.mrb[2].mxu1 %vm82_vm1, %v26_v28  ;;  %761 = vmatprep.mubr.f32.mxu0 %v8843_v4 }
  0x93   :  { %769 = vmatpush1.msra.mxu1 %v680_v40  ;;  %839 = vmatprep.subr.mxu0 %v683_v39 }
  0x94   :  { %2985 = vrot.lane.b32.xlu0 %v8899_v0, %s8851_s21  ;;  %2987 = vrot.lane.b32.xlu1 %v8911_v2, %s8851_s21  ;;  %v674_v43 = vpop.permute.xlu0 %673  ;;  %v676_v44 = vpop.permute.xlu1 %675 }
  0x95   :  { %8469 = vmatmul.mubr.msk.f32.vlgmr.msra.gmra.mrb[0].mxu0 %vm82_vm1, %v8468_v41  ;;  %832 = vmatprep.mubr.f32.mxu1 %v8843_v4  ;;  %v685_v45 = vsel %vm677_vm2, %v674_v43, %v676_v44  ;;  %v684_v46 = vsel %vm677_vm2, %v672_v38, %v674_v43  ;;  %vm5657_vm2 = vcmask 539648  }
  0x96   :  { %840 = vmatpush1.msra.mxu0 %v682_v42  ;;  %910 = vmatprep.subr.mxu1 %v685_v45 }
  0x97   :  { %8470 = vmatmul.mubr.msk.f32.vlgmr.msra.gmra.mrb[0].mxu1 %vm82_vm1, %v8468_v41  ;;  %903 = vmatprep.mubr.f32.mxu0 %v8843_v4 }
  0x98   :  { %2983 = vrot.lane.b32.xlu0 %v8904_v1, %s8851_s21  ;;  %2989 = vrot.lane.b32.xlu1 %v8916_v3, %s8851_s21  ;;  %v994_v47 = vpop.permute.xlu0 %993  ;;  %v996_v48 = vpop.permute.xlu1 %995 }
  0x99   :  { %911 = vmatpush1.msra.mxu1 %v684_v46  ;;  %v1011_v49 = vsel %vm1009_vm3, %v994_v47, %v996_v48  ;;  %8471 = vmatmul.mubr.msk.f32.vlgmr.msra.gmra.mrb[2].mxu0 %vm82_vm1, %v8468_v41 }
  0x9a   :  { %1029 = vmatprep.subr.mxu0 %v1011_v49  ;;  %974 = vmatprep.mubr.f32.mxu1 %v8843_v4 }
  0x9b   :  { %8472 = vmatmul.mubr.msk.f32.vlgmr.msra.gmra.mrb[2].mxu1 %vm82_vm1, %v8468_v41  ;;  %1093 = vmatprep.mubr.f32.mxu0 %v8843_v4 }
  0x9c   :  { %2991 = vrot.lane.b32.xlu0 %v8925_v5, %s8851_s21  ;;  %2993 = vrot.lane.b32.xlu1 %v8930_v6, %s8851_s21  ;;  %v992_v50 = vpop.permute.xlu0 %991  ;;  %v998_v51 = vpop.permute.xlu1 %997 }
  0x9d   :  { %v1010_v53 = vsel %vm1009_vm3, %v992_v50, %v994_v47  ;;  %1164 = vmatprep.mubr.f32.mxu1 %v8843_v4  ;;  %v1012_v57 = vsel %vm1009_vm3, %v996_v48, %v998_v51 }
  0x9e   :  { %1030 = vmatpush1.msra.mxu0 %v1010_v53 }
  0x9f   :  { %8474 = vmatmul.mubr.msk.f32.vlgmr.msra.gmra.mrb[0].mxu0 %vm82_vm1, %v8473_v52 }
  0xa0   :  { %2995 = vrot.lane.b32.xlu0 %v8937_v7, %s8851_s21  ;;  %2997 = vrot.lane.b32.xlu1 %v8942_v8, %s8851_s21  ;;  %v1000_v54 = vpop.permute.xlu0 %999  ;;  %v1002_v55 = vpop.permute.xlu1 %1001 }
  0xa1   :  { %v1013_v56 = vsel %vm1009_vm3, %v998_v51, %v1000_v54  ;;  %1235 = vmatprep.mubr.f32.mxu0 %v8843_v4  ;;  %v1014_v61 = vsel %vm1009_vm3, %v1000_v54, %v1002_v55 }
  0xa2   :  { %1100 = vmatprep.subr.mxu1 %v1013_v56 }
  0xa3   :  { %1101 = vmatpush1.msra.mxu1 %v1012_v57 }
  0xa4   :  { %2999 = vrot.lane.b32.xlu0 %v8949_v9, %s8851_s21  ;;  %3317 = vrot.lane.b32.xlu1 %v8899_v0, %s8852_s24  ;;  %v1004_v58 = vpop.permute.xlu0 %1003  ;;  %v1006_v59 = vpop.permute.xlu1 %1005  ;;  %s8859_s21 = smov 66  }
  0xa5   :  { %v1015_v60 = vsel %vm1009_vm3, %v1002_v55, %v1004_v58  ;;  %8475 = vmatmul.mubr.msk.f32.vlgmr.msra.gmra.mrb[0].mxu1 %vm82_vm1, %v8473_v52  ;;  %v1016_v11 = vsel %vm1009_vm3, %v1004_v58, %v1006_v59 }
  0xa6   :  { %1171 = vmatprep.subr.mxu0 %v1015_v60  ;;  %1306 = vmatprep.mubr.f32.mxu1 %v8843_v4 }
  0xa7   :  { %1172 = vmatpush1.msra.mxu0 %v1014_v61 }
  0xa8   :  { %3319 = vrot.lane.b32.xlu0 %v8911_v2, %s8852_s24  ;;  %3315 = vrot.lane.b32.xlu1 %v8904_v1, %s8852_s24  ;;  %v1008_v62 = vpop.permute.xlu0 %1007  ;;  %v1326_v63 = vpop.permute.xlu1 %1325 }
  0xa9   :  { %v1017_v10 = vsel %vm1009_vm3, %v1006_v59, %v1008_v62  ;;  %8476 = vmatmul.mubr.msk.f32.vlgmr.msra.gmra.mrb[2].mxu0 %vm82_vm1, %v8473_v52  ;;  %vm5989_vm3 = vcmask 531456  }
  0xaa   :  { %1242 = vmatprep.subr.mxu1 %v1017_v10  ;;  %1425 = vmatprep.mubr.f32.mxu0 %v8843_v4 }
  0xab   :  { %1243 = vmatpush1.msra.mxu1 %v1016_v11 }
  0xac   :  { %3321 = vrot.lane.b32.xlu0 %v8916_v3, %s8852_s24  ;;  %3323 = vrot.lane.b32.xlu1 %v8925_v5, %s8852_s24  ;;  %v1328_v12 = vpop.permute.xlu0 %1327  ;;  %v1324_v13 = vpop.permute.xlu1 %1323 }
  0xad   :  { %v1342_v14 = vsel %vm1341_vm4, %v1324_v13, %v1326_v63  ;;  %v1343_v15 = vsel %vm1341_vm4, %v1326_v63, %v1328_v12  ;;  %8477 = vmatmul.mubr.msk.f32.vlgmr.msra.gmra.mrb[2].mxu1 %vm82_vm1, %v8473_v52  ;;  %v8488_v52 = vld [vmem:[%s9874_s1 + $0x30] sm:$0xff] }
  0xae   :  { %1361 = vmatprep.subr.mxu0 %v1343_v15  ;;  %1496 = vmatprep.mubr.f32.mxu1 %v8843_v4 }
  0xaf   :  { %1362 = vmatpush1.msra.mxu0 %v1342_v14 }
  0xb0   :  { %3325 = vrot.lane.b32.xlu0 %v8930_v6, %s8852_s24  ;;  %3327 = vrot.lane.b32.xlu1 %v8937_v7, %s8852_s24  ;;  %v1330_v17 = vpop.permute.xlu0 %1329  ;;  %v1332_v18 = vpop.permute.xlu1 %1331 }
  0xb1   :  { %v1345_v19 = vsel %vm1341_vm4, %v1330_v17, %v1332_v18  ;;  %v1344_v20 = vsel %vm1341_vm4, %v1328_v12, %v1330_v17  ;;  %8479 = vmatmul.mubr.msk.f32.vlgmr.msra.gmra.mrb[0].mxu0 %vm82_vm1, %v8478_v16 }
  0xb2   :  { %1432 = vmatprep.subr.mxu1 %v1345_v19  ;;  %1567 = vmatprep.mubr.f32.mxu0 %v8843_v4 }
  0xb3   :  { %1433 = vmatpush1.msra.mxu1 %v1344_v20 }
  0xb4   :  { %3329 = vrot.lane.b32.xlu0 %v8942_v8, %s8852_s24  ;;  %3331 = vrot.lane.b32.xlu1 %v8949_v9, %s8852_s24  ;;  %v1334_v21 = vpop.permute.xlu0 %1333  ;;  %v1336_v22 = vpop.permute.xlu1 %1335 }
  0xb5   :  { %v1347_v23 = vsel %vm1341_vm4, %v1334_v21, %v1336_v22  ;;  %v1346_v24 = vsel %vm1341_vm4, %v1332_v18, %v1334_v21  ;;  %8480 = vmatmul.mubr.msk.f32.vlgmr.msra.gmra.mrb[0].mxu1 %vm82_vm1, %v8478_v16 }
  0xb6   :  { %1503 = vmatprep.subr.mxu0 %v1347_v23  ;;  %1638 = vmatprep.mubr.f32.mxu1 %v8843_v4 }
  0xb7   :  { %1504 = vmatpush1.msra.mxu0 %v1346_v24 }
  0xb8   :  { %3649 = vrot.lane.b32.xlu0 %v8899_v0, %s8853_s27  ;;  %3651 = vrot.lane.b32.xlu1 %v8911_v2, %s8853_s27  ;;  %v1338_v25 = vpop.permute.xlu0 %1337  ;;  %v1340_v26 = vpop.permute.xlu1 %1339 }
  0xb9   :  { %v1349_v27 = vsel %vm1341_vm4, %v1338_v25, %v1340_v26  ;;  %v1348_v28 = vsel %vm1341_vm4, %v1336_v22, %v1338_v25  ;;  %8481 = vmatmul.mubr.msk.f32.vlgmr.msra.gmra.mrb[2].mxu0 %vm82_vm1, %v8478_v16  ;;  %vm6321_vm4 = vcmask 523264  }
  0xba   :  { %1574 = vmatprep.subr.mxu1 %v1349_v27  ;;  %1757 = vmatprep.mubr.f32.mxu0 %v8843_v4 }
  0xbb   :  { %1575 = vmatpush1.msra.mxu1 %v1348_v28 }
  0xbc   :  { %3647 = vrot.lane.b32.xlu0 %v8904_v1, %s8853_s27  ;;  %3653 = vrot.lane.b32.xlu1 %v8916_v3, %s8853_s27  ;;  %v1658_v29 = vpop.permute.xlu0 %1657  ;;  %v1660_v30 = vpop.permute.xlu1 %1659 }
  0xbd   :  { %v1675_v31 = vsel %vm1673_vm5, %v1658_v29, %v1660_v30  ;;  %8482 = vmatmul.mubr.msk.f32.vlgmr.msra.gmra.mrb[2].mxu1 %vm82_vm1, %v8478_v16  ;;  %v8493_v16 = vld [vmem:[%s9874_s1 + $0x38] sm:$0xff] }
  0xbe   :  { %1693 = vmatprep.subr.mxu0 %v1675_v31  ;;  %1828 = vmatprep.mubr.f32.mxu1 %v8843_v4 }
  0xc0   :  { %3655 = vrot.lane.b32.xlu0 %v8925_v5, %s8853_s27  ;;  %3657 = vrot.lane.b32.xlu1 %v8930_v6, %s8853_s27  ;;  %v1656_v32 = vpop.permute.xlu0 %1655  ;;  %v1662_v33 = vpop.permute.xlu1 %1661 }
  0xc1   :  { %v1674_v35 = vsel %vm1673_vm5, %v1656_v32, %v1658_v29  ;;  %v1676_v39 = vsel %vm1673_vm5, %v1660_v30, %v1662_v33 }
  0xc2   :  { %1694 = vmatpush1.msra.mxu0 %v1674_v35 }
  0xc3   :  { %8484 = vmatmul.mubr.msk.f32.vlgmr.msra.gmra.mrb[0].mxu0 %vm82_vm1, %v8483_v34 }
  0xc4   :  { %3659 = vrot.lane.b32.xlu0 %v8937_v7, %s8853_s27  ;;  %3661 = vrot.lane.b32.xlu1 %v8942_v8, %s8853_s27  ;;  %v1664_v36 = vpop.permute.xlu0 %1663  ;;  %v1666_v37 = vpop.permute.xlu1 %1665 }
  0xc5   :  { %v1677_v38 = vsel %vm1673_vm5, %v1662_v33, %v1664_v36  ;;  %1899 = vmatprep.mubr.f32.mxu0 %v8843_v4  ;;  %v1678_v43 = vsel %vm1673_vm5, %v1664_v36, %v1666_v37 }
  0xc6   :  { %1764 = vmatprep.subr.mxu1 %v1677_v38 }
  0xc7   :  { %1765 = vmatpush1.msra.mxu1 %v1676_v39 }
  0xc8   :  { %3663 = vrot.lane.b32.xlu0 %v8949_v9, %s8853_s27  ;;  %3981 = vrot.lane.b32.xlu1 %v8899_v0, %s8854_s30  ;;  %v1668_v40 = vpop.permute.xlu0 %1667  ;;  %v1670_v41 = vpop.permute.xlu1 %1669 }
  0xc9   :  { %v1679_v42 = vsel %vm1673_vm5, %v1666_v37, %v1668_v40  ;;  %8485 = vmatmul.mubr.msk.f32.vlgmr.msra.gmra.mrb[0].mxu1 %vm82_vm1, %v8483_v34  ;;  %v1680_v47 = vsel %vm1673_vm5, %v1668_v40, %v1670_v41 }
  0xca   :  { %1835 = vmatprep.subr.mxu0 %v1679_v42  ;;  %1970 = vmatprep.mubr.f32.mxu1 %v8843_v4 }
  0xcb   :  { %1836 = vmatpush1.msra.mxu0 %v1678_v43 }
  0xcc   :  { %3983 = vrot.lane.b32.xlu0 %v8911_v2, %s8854_s30  ;;  %3979 = vrot.lane.b32.xlu1 %v8904_v1, %s8854_s30  ;;  %v1672_v44 = vpop.permute.xlu0 %1671  ;;  %v1990_v45 = vpop.permute.xlu1 %1989 }
  0xcd   :  { %v1681_v46 = vsel %vm1673_vm5, %v1670_v41, %v1672_v44  ;;  %8486 = vmatmul.mubr.msk.f32.vlgmr.msra.gmra.mrb[2].mxu0 %vm82_vm1, %v8483_v34  ;;  %vm6653_vm5 = vcmask 392192  }
  0xce   :  { %1906 = vmatprep.subr.mxu1 %v1681_v46  ;;  %2089 = vmatprep.mubr.f32.mxu0 %v8843_v4 }
  0xcf   :  { %1907 = vmatpush1.msra.mxu1 %v1680_v47 }
  0xd0   :  { %3985 = vrot.lane.b32.xlu0 %v8916_v3, %s8854_s30  ;;  %3987 = vrot.lane.b32.xlu1 %v8925_v5, %s8854_s30  ;;  %v1992_v48 = vpop.permute.xlu0 %1991  ;;  %v1988_v49 = vpop.permute.xlu1 %1987 }
  0xd1   :  { %v2006_v50 = vsel %vm2005_vm6, %v1988_v49, %v1990_v45  ;;  %v2007_v51 = vsel %vm2005_vm6, %v1990_v45, %v1992_v48  ;;  %8487 = vmatmul.mubr.msk.f32.vlgmr.msra.gmra.mrb[2].mxu1 %vm82_vm1, %v8483_v34  ;;  %v8498_v34 = vld [vmem:[%s9874_s1 + $0x40] sm:$0xff] }
  0xd2   :  { %2025 = vmatprep.subr.mxu0 %v2007_v51  ;;  %2160 = vmatprep.mubr.f32.mxu1 %v8843_v4 }
  0xd3   :  { %2026 = vmatpush1.msra.mxu0 %v2006_v50 }
  0xd4   :  { %3989 = vrot.lane.b32.xlu0 %v8930_v6, %s8854_s30  ;;  %3991 = vrot.lane.b32.xlu1 %v8937_v7, %s8854_s30  ;;  %v1994_v53 = vpop.permute.xlu0 %1993  ;;  %v1996_v54 = vpop.permute.xlu1 %1995 }
  0xd5   :  { %v2009_v55 = vsel %vm2005_vm6, %v1994_v53, %v1996_v54  ;;  %v2008_v56 = vsel %vm2005_vm6, %v1992_v48, %v1994_v53  ;;  %8489 = vmatmul.mubr.msk.f32.vlgmr.msra.gmra.mrb[0].mxu0 %vm82_vm1, %v8488_v52  ;;  %v8503_v53 = vld [vmem:[%s9874_s1 + $0x48] sm:$0xff] }
  0xd6   :  { %2096 = vmatprep.subr.mxu1 %v2009_v55  ;;  %2231 = vmatprep.mubr.f32.mxu0 %v8843_v4 }
  0xd7   :  { %2097 = vmatpush1.msra.mxu1 %v2008_v56 }
  0xd8   :  { %3993 = vrot.lane.b32.xlu0 %v8942_v8, %s8854_s30  ;;  %3995 = vrot.lane.b32.xlu1 %v8949_v9, %s8854_s30  ;;  %v1998_v57 = vpop.permute.xlu0 %1997  ;;  %v2000_v58 = vpop.permute.xlu1 %1999 }
  0xd9   :  { %v2011_v59 = vsel %vm2005_vm6, %v1998_v57, %v2000_v58  ;;  %v2010_v60 = vsel %vm2005_vm6, %v1996_v54, %v1998_v57  ;;  %8490 = vmatmul.mubr.msk.f32.vlgmr.msra.gmra.mrb[0].mxu1 %vm82_vm1, %v8488_v52 }
  0xda   :  { %2167 = vmatprep.subr.mxu0 %v2011_v59  ;;  %2302 = vmatprep.mubr.f32.mxu1 %v8843_v4 }
  0xdb   :  { %2168 = vmatpush1.msra.mxu0 %v2010_v60 }
  0xdc   :  { %4313 = vrot.lane.b32.xlu0 %v8899_v0, %s8855_s7  ;;  %4315 = vrot.lane.b32.xlu1 %v8911_v2, %s8855_s7  ;;  %v2002_v61 = vpop.permute.xlu0 %2001  ;;  %v2004_v62 = vpop.permute.xlu1 %2003 }
  0xdd   :  { %v2013_v63 = vsel %vm2005_vm6, %v2002_v61, %v2004_v62  ;;  %v2012_v10 = vsel %vm2005_vm6, %v2000_v58, %v2002_v61  ;;  %8491 = vmatmul.mubr.msk.f32.vlgmr.msra.gmra.mrb[2].mxu0 %vm82_vm1, %v8488_v52  ;;  %vm6985_vm6 = vcmask 384000  }
  0xde   :  { %2238 = vmatprep.subr.mxu1 %v2013_v63  ;;  %2421 = vmatprep.mubr.f32.mxu0 %v8843_v4 }
  0xdf   :  { %2239 = vmatpush1.msra.mxu1 %v2012_v10 }
  0xe0   :  { %4311 = vrot.lane.b32.xlu0 %v8904_v1, %s8855_s7  ;;  %4317 = vrot.lane.b32.xlu1 %v8916_v3, %s8855_s7  ;;  %v2322_v11 = vpop.permute.xlu0 %2321  ;;  %v2324_v12 = vpop.permute.xlu1 %2323 }
  0xe1   :  { %v2339_v13 = vsel %vm2337_vm7, %v2322_v11, %v2324_v12  ;;  %8492 = vmatmul.mubr.msk.f32.vlgmr.msra.gmra.mrb[2].mxu1 %vm82_vm1, %v8488_v52 }
  0xe2   :  { %2357 = vmatprep.subr.mxu0 %v2339_v13  ;;  %2492 = vmatprep.mubr.f32.mxu1 %v8843_v4 }
  0xe4   :  { %4319 = vrot.lane.b32.xlu0 %v8925_v5, %s8855_s7  ;;  %4321 = vrot.lane.b32.xlu1 %v8930_v6, %s8855_s7  ;;  %v2320_v14 = vpop.permute.xlu0 %2319  ;;  %v2326_v15 = vpop.permute.xlu1 %2325 }
  0xe5   :  { %v2338_v17 = vsel %vm2337_vm7, %v2320_v14, %v2322_v11  ;;  %v2340_v21 = vsel %vm2337_vm7, %v2324_v12, %v2326_v15 }
  0xe6   :  { %2358 = vmatpush1.msra.mxu0 %v2338_v17 }
  0xe7   :  { %8494 = vmatmul.mubr.msk.f32.vlgmr.msra.gmra.mrb[0].mxu0 %vm82_vm1, %v8493_v16 }
  0xe8   :  { %4323 = vrot.lane.b32.xlu0 %v8937_v7, %s8855_s7  ;;  %4325 = vrot.lane.b32.xlu1 %v8942_v8, %s8855_s7  ;;  %v2328_v18 = vpop.permute.xlu0 %2327  ;;  %v2330_v19 = vpop.permute.xlu1 %2329 }
  0xe9   :  { %v2341_v20 = vsel %vm2337_vm7, %v2326_v15, %v2328_v18  ;;  %2563 = vmatprep.mubr.f32.mxu0 %v8843_v4  ;;  %v2342_v25 = vsel %vm2337_vm7, %v2328_v18, %v2330_v19  ;;  %v9373_v18 = vld [vmem:[%s9873_s0 + $0x8] sm:$0xff] }
  0xea   :  { %2428 = vmatprep.subr.mxu1 %v2341_v20 }
  0xeb   :  { %2429 = vmatpush1.msra.mxu1 %v2340_v21 }
  0xec   :  { %4327 = vrot.lane.b32.xlu0 %v8949_v9, %s8855_s7  ;;  %4645 = vrot.lane.b32.xlu1 %v8899_v0, %s8856_s10  ;;  %v2332_v22 = vpop.permute.xlu0 %2331 }
  0xed   :  { %v2334_v23 = vpop.permute.xlu1 %2333  ;;  %v2343_v24 = vsel %vm2337_vm7, %v2330_v19, %v2332_v22  ;;  %8495 = vmatmul.mubr.msk.f32.vlgmr.msra.gmra.mrb[0].mxu1 %vm82_vm1, %v8493_v16 }
  0xee   :  { %2499 = vmatprep.subr.mxu0 %v2343_v24  ;;  %2634 = vmatprep.mubr.f32.mxu1 %v8843_v4  ;;  %v2344_v29 = vsel %vm2337_vm7, %v2332_v22, %v2334_v23  ;;  %v9391_v22 = vld [vmem:[%s9873_s0] sm:$0xff] }
  0xef   :  { %2500 = vmatpush1.msra.mxu0 %v2342_v25 }
  0xf0   :  { %4647 = vrot.lane.b32.xlu0 %v8911_v2, %s8856_s10  ;;  %4643 = vrot.lane.b32.xlu1 %v8904_v1, %s8856_s10  ;;  %v2336_v26 = vpop.permute.xlu0 %2335 }
  0xf1   :  { %v2654_v27 = vpop.permute.xlu1 %2653  ;;  %v2345_v28 = vsel %vm2337_vm7, %v2334_v23, %v2336_v26  ;;  %8496 = vmatmul.mubr.msk.f32.vlgmr.msra.gmra.mrb[2].mxu0 %vm82_vm1, %v8493_v16  ;;  %v9398_v23 = vld [vmem:[%s9873_s0 + $0x18] sm:$0xff]  ;;  %vm7317_vm7 = vcmask 375808  }
  0xf2   :  { %2570 = vmatprep.subr.mxu1 %v2345_v28  ;;  %2753 = vmatprep.mubr.f32.mxu0 %v8843_v4  ;;  %v9415_v28 = vld [vmem:[%s9873_s0 + $0x28] sm:$0xff] }
  0xf3   :  { %2571 = vmatpush1.msra.mxu1 %v2344_v29 }
  0xf4   :  { %4649 = vrot.lane.b32.xlu0 %v8916_v3, %s8856_s10  ;;  %4651 = vrot.lane.b32.xlu1 %v8925_v5, %s8856_s10  ;;  %v2656_v30 = vpop.permute.xlu0 %2655 }
  0xf5   :  { %v2652_v31 = vpop.permute.xlu1 %2651  ;;  %v2671_v32 = vsel %vm2669_vm8, %v2654_v27, %v2656_v30  ;;  %8497 = vmatmul.mubr.msk.f32.vlgmr.msra.gmra.mrb[2].mxu1 %vm82_vm1, %v8493_v16 }
  0xf6   :  { %v2670_v33 = vsel %vm2669_vm8, %v2652_v31, %v2654_v27  ;;  %2689 = vmatprep.subr.mxu0 %v2671_v32  ;;  %2824 = vmatprep.mubr.f32.mxu1 %v8843_v4  ;;  %v9408_v27 = vld [vmem:[%s9873_s0 + $0x20] sm:$0xff]  ;;  %v8513_v32 = vld [vmem:[%s9874_s1 + $0x58] sm:$0xff] }
  0xf7   :  { %2690 = vmatpush1.msra.mxu0 %v2670_v33  ;;  %v9427_v33 = vld [vmem:[%s9873_s0 + $0x30] sm:$0xff] }
  0xf8   :  { %4653 = vrot.lane.b32.xlu0 %v8930_v6, %s8856_s10  ;;  %4655 = vrot.lane.b32.xlu1 %v8937_v7, %s8856_s10  ;;  %v2658_v35 = vpop.permute.xlu0 %2657 }
  0xf9   :  { %v2660_v36 = vpop.permute.xlu1 %2659  ;;  %8499 = vmatmul.mubr.msk.f32.vlgmr.msra.gmra.mrb[0].mxu0 %vm82_vm1, %v8498_v34  ;;  %v2672_v38 = vsel %vm2669_vm8, %v2656_v30, %v2658_v35 }
  0xfa   :  { %v2673_v37 = vsel %vm2669_vm8, %v2658_v35, %v2660_v36  ;;  %2895 = vmatprep.mubr.f32.mxu0 %v8843_v4 }
  0xfb   :  { %2760 = vmatprep.subr.mxu1 %v2673_v37 }
  0xfc   :  { %4657 = vrot.lane.b32.xlu0 %v8942_v8, %s8856_s10  ;;  %4659 = vrot.lane.b32.xlu1 %v8949_v9, %s8856_s10  ;;  %v2662_v39 = vpop.permute.xlu0 %2661 }
  0xfd   :  { %2761 = vmatpush1.msra.mxu1 %v2672_v38  ;;  %v2664_v40 = vpop.permute.xlu1 %2663  ;;  %v2674_v42 = vsel %vm2669_vm8, %v2660_v36, %v2662_v39  ;;  %v9444_v38 = vld [vmem:[%s9873_s0 + $0x40] sm:$0xff] }
  0xfe   :  { %v2675_v41 = vsel %vm2669_vm8, %v2662_v39, %v2664_v40  ;;  %8500 = vmatmul.mubr.msk.f32.vlgmr.msra.gmra.mrb[0].mxu1 %vm82_vm1, %v8498_v34 }
  0xff   :  { %2831 = vmatprep.subr.mxu0 %v2675_v41  ;;  %2966 = vmatprep.mubr.f32.mxu1 %v8843_v4 }
 0x100   :  { %4977 = vrot.lane.b32.xlu0 %v8899_v0, %s8857_s13  ;;  %4979 = vrot.lane.b32.xlu1 %v8911_v2, %s8857_s13 }
 0x101   :  { %2832 = vmatpush1.msra.mxu0 %v2674_v42 }
 0x102   :  { %v2666_v43 = vpop.permute.xlu0 %2665  ;;  %v2668_v44 = vpop.permute.xlu1 %2667  ;;  %8501 = vmatmul.mubr.msk.f32.vlgmr.msra.gmra.mrb[2].mxu0 %vm82_vm1, %v8498_v34 }
 0x103   :  { %v2677_v45 = vsel %vm2669_vm8, %v2666_v43, %v2668_v44  ;;  %v2676_v46 = vsel %vm2669_vm8, %v2664_v40, %v2666_v43  ;;  %3085 = vmatprep.mubr.f32.mxu0 %v8843_v4  ;;  %vm7649_vm8 = vcmask 367616  }
 0x104   :  { %4975 = vrot.lane.b32.xlu0 %v8904_v1, %s8857_s13  ;;  %4981 = vrot.lane.b32.xlu1 %v8916_v3, %s8857_s13 }
 0x105   :  { %2902 = vmatprep.subr.mxu1 %v2677_v45 }
 0x106   :  { %2903 = vmatpush1.msra.mxu1 %v2676_v46  ;;  %v2986_v47 = vpop.permute.xlu0 %2985  ;;  %v2988_v48 = vpop.permute.xlu1 %2987 }
 0x107   :  { %v3003_v49 = vsel %vm3001_vm9, %v2986_v47, %v2988_v48  ;;  %8502 = vmatmul.mubr.msk.f32.vlgmr.msra.gmra.mrb[2].mxu1 %vm82_vm1, %v8498_v34  ;;  %v9434_v34 = vld [vmem:[%s9873_s0 + $0x38] sm:$0xff] }
 0x108   :  { %4983 = vrot.lane.b32.xlu0 %v8925_v5, %s8857_s13  ;;  %4985 = vrot.lane.b32.xlu1 %v8930_v6, %s8857_s13 }
 0x109   :  { %3021 = vmatprep.subr.mxu0 %v3003_v49  ;;  %3156 = vmatprep.mubr.f32.mxu1 %v8843_v4 }
 0x10a   :  { %v2984_v50 = vpop.permute.xlu0 %2983  ;;  %v2990_v51 = vpop.permute.xlu1 %2989 }
 0x10b   :  { %v3002_v52 = vsel %vm3001_vm9, %v2984_v50, %v2986_v47  ;;  %v3004_v57 = vsel %vm3001_vm9, %v2988_v48, %v2990_v51 }
 0x10c   :  { %4987 = vrot.lane.b32.xlu0 %v8937_v7, %s8857_s13  ;;  %4989 = vrot.lane.b32.xlu1 %v8942_v8, %s8857_s13 }
 0x10d   :  { %3022 = vmatpush1.msra.mxu0 %v3002_v52  ;;  %v8518_v52 = vld [vmem:[%s9874_s1 + $0x60] sm:$0xff] }
 0x10e   :  { %v2992_v54 = vpop.permute.xlu0 %2991  ;;  %v2994_v55 = vpop.permute.xlu1 %2993  ;;  %8504 = vmatmul.mubr.msk.f32.vlgmr.msra.gmra.mrb[0].mxu0 %vm82_vm1, %v8503_v53 }
 0x10f   :  { %v3005_v56 = vsel %vm3001_vm9, %v2990_v51, %v2992_v54  ;;  %3227 = vmatprep.mubr.f32.mxu0 %v8843_v4  ;;  %v3006_v61 = vsel %vm3001_vm9, %v2992_v54, %v2994_v55 }
 0x110   :  { %4991 = vrot.lane.b32.xlu0 %v8949_v9, %s8857_s13  ;;  %5309 = vrot.lane.b32.xlu1 %v8899_v0, %s8858_s16 }
 0x111   :  { %3092 = vmatprep.subr.mxu1 %v3005_v56 }
 0x112   :  { %3093 = vmatpush1.msra.mxu1 %v3004_v57  ;;  %v2996_v58 = vpop.permute.xlu0 %2995  ;;  %v2998_v59 = vpop.permute.xlu1 %2997 }
 0x113   :  { %v3007_v60 = vsel %vm3001_vm9, %v2994_v55, %v2996_v58  ;;  %8505 = vmatmul.mubr.msk.f32.vlgmr.msra.gmra.mrb[0].mxu1 %vm82_vm1, %v8503_v53 }
 0x114   :  { %5311 = vrot.lane.b32.xlu0 %v8911_v2, %s8858_s16  ;;  %5307 = vrot.lane.b32.xlu1 %v8904_v1, %s8858_s16  ;;  %v3008_v1 = vsel %vm3001_vm9, %v2996_v58, %v2998_v59 }
 0x115   :  { %3163 = vmatprep.subr.mxu0 %v3007_v60  ;;  %3298 = vmatprep.mubr.f32.mxu1 %v8843_v4 }
 0x116   :  { %3164 = vmatpush1.msra.mxu0 %v3006_v61  ;;  %v3000_v0 = vpop.permute.xlu0 %2999  ;;  %v3318_v62 = vpop.permute.xlu1 %3317 }
 0x117   :  { %v3009_v63 = vsel %vm3001_vm9, %v2998_v59, %v3000_v0  ;;  %8506 = vmatmul.mubr.msk.f32.vlgmr.msra.gmra.mrb[2].mxu0 %vm82_vm1, %v8503_v53  ;;  %vm7981_vm9 = vcmask 359424  }
 0x118   :  { %5313 = vrot.lane.b32.xlu0 %v8916_v3, %s8858_s16  ;;  %5315 = vrot.lane.b32.xlu1 %v8925_v5, %s8858_s16  ;;  %v8508_v3 = vld [vmem:[%s9874_s1 + $0x50] sm:$0xff] }
 0x119   :  { %3234 = vmatprep.subr.mxu1 %v3009_v63  ;;  %3417 = vmatprep.mubr.f32.mxu0 %v8843_v4 }
 0x11a   :  { %3235 = vmatpush1.msra.mxu1 %v3008_v1  ;;  %v3320_v2 = vpop.permute.xlu0 %3319  ;;  %v3316_v10 = vpop.permute.xlu1 %3315 }
 0x11b   :  { %v3334_v11 = vsel %vm3333_vm10, %v3316_v10, %v3318_v62  ;;  %v3335_v12 = vsel %vm3333_vm10, %v3318_v62, %v3320_v2  ;;  %8507 = vmatmul.mubr.msk.f32.vlgmr.msra.gmra.mrb[2].mxu1 %vm82_vm1, %v8503_v53 }
 0x11c   :  { %5317 = vrot.lane.b32.xlu0 %v8930_v6, %s8858_s16  ;;  %5319 = vrot.lane.b32.xlu1 %v8937_v7, %s8858_s16 }
 0x11d   :  { %3353 = vmatprep.subr.mxu0 %v3335_v12  ;;  %3488 = vmatprep.mubr.f32.mxu1 %v8843_v4 }
 0x11e   :  { %3354 = vmatpush1.msra.mxu0 %v3334_v11  ;;  %v3322_v5 = vpop.permute.xlu0 %3321  ;;  %v3324_v13 = vpop.permute.xlu1 %3323 }
 0x11f   :  { %v3337_v14 = vsel %vm3333_vm10, %v3322_v5, %v3324_v13  ;;  %v3336_v15 = vsel %vm3333_vm10, %v3320_v2, %v3322_v5  ;;  %8509 = vmatmul.mubr.msk.f32.vlgmr.msra.gmra.mrb[0].mxu0 %vm82_vm1, %v8508_v3  ;;  %v8523_v5 = vld [vmem:[%s9874_s1 + $0x68] sm:$0xff] }
 0x120   :  { %5321 = vrot.lane.b32.xlu0 %v8942_v8, %s8858_s16  ;;  %5323 = vrot.lane.b32.xlu1 %v8949_v9, %s8858_s16  ;;  %v9380_v8 = vld [vmem:[%s9873_s0 + $0x10] sm:$0xff]  ;;  %s8861_s16 = smov 64  }
 0x121   :  { %3424 = vmatprep.subr.mxu1 %v3337_v14  ;;  %3559 = vmatprep.mubr.f32.mxu0 %v8843_v4 }
 0x122   :  { %3425 = vmatpush1.msra.mxu1 %v3336_v15  ;;  %v3326_v6 = vpop.permute.xlu0 %3325  ;;  %v3328_v7 = vpop.permute.xlu1 %3327 }
 0x123   :  { %v3339_v16 = vsel %vm3333_vm10, %v3326_v6, %v3328_v7  ;;  %v3338_v17 = vsel %vm3333_vm10, %v3324_v13, %v3326_v6  ;;  %8510 = vmatmul.mubr.msk.f32.vlgmr.msra.gmra.mrb[0].mxu1 %vm82_vm1, %v8508_v3 }
 0x124   :  { %5641 = vrot.lane.b32.xlu0 %v9373_v18, %s8859_s21  ;;  %5643 = vrot.lane.b32.xlu1 %v9380_v8, %s8859_s21 }
 0x125   :  { %3495 = vmatprep.subr.mxu0 %v3339_v16  ;;  %3630 = vmatprep.mubr.f32.mxu1 %v8843_v4 }
 0x126   :  { %3496 = vmatpush1.msra.mxu0 %v3338_v17  ;;  %v3330_v9 = vpop.permute.xlu0 %3329  ;;  %v3332_v19 = vpop.permute.xlu1 %3331 }
 0x127   :  { %v3341_v20 = vsel %vm3333_vm10, %v3330_v9, %v3332_v19  ;;  %v3340_v21 = vsel %vm3333_vm10, %v3328_v7, %v3330_v9  ;;  %8511 = vmatmul.mubr.msk.f32.vlgmr.msra.gmra.mrb[2].mxu0 %vm82_vm1, %v8508_v3 }
 0x128   :  { %5639 = vrot.lane.b32.xlu0 %v9391_v22, %s8859_s21  ;;  %5645 = vrot.lane.b32.xlu1 %v9398_v23, %s8859_s21 }
 0x129   :  { %3566 = vmatprep.subr.mxu1 %v3341_v20  ;;  %3749 = vmatprep.mubr.f32.mxu0 %v8843_v4 }
 0x12a   :  { %3567 = vmatpush1.msra.mxu1 %v3340_v21  ;;  %v3650_v24 = vpop.permute.xlu0 %3649  ;;  %v3652_v25 = vpop.permute.xlu1 %3651 }
 0x12b   :  { %v3667_v26 = vsel %vm3665_vm11, %v3650_v24, %v3652_v25  ;;  %8512 = vmatmul.mubr.msk.f32.vlgmr.msra.gmra.mrb[2].mxu1 %vm82_vm1, %v8508_v3 }
 0x12c   :  { %5647 = vrot.lane.b32.xlu0 %v9408_v27, %s8859_s21  ;;  %5649 = vrot.lane.b32.xlu1 %v9415_v28, %s8859_s21 }
 0x12d   :  { %3685 = vmatprep.subr.mxu0 %v3667_v26  ;;  %3820 = vmatprep.mubr.f32.mxu1 %v8843_v4 }
 0x12e   :  { %v3648_v29 = vpop.permute.xlu0 %3647  ;;  %v3654_v30 = vpop.permute.xlu1 %3653 }
 0x12f   :  { %v3666_v31 = vsel %vm3665_vm11, %v3648_v29, %v3650_v24  ;;  %v3668_v39 = vsel %vm3665_vm11, %v3652_v25, %v3654_v30 }
 0x130   :  { %5651 = vrot.lane.b32.xlu0 %v9427_v33, %s8859_s21  ;;  %5653 = vrot.lane.b32.xlu1 %v9434_v34, %s8859_s21 }
 0x131   :  { %3686 = vmatpush1.msra.mxu0 %v3666_v31  ;;  %v8528_v31 = vld [vmem:[%s9874_s1 + $0x70] sm:$0xff] }
 0x132   :  { %v3656_v35 = vpop.permute.xlu0 %3655  ;;  %v3658_v36 = vpop.permute.xlu1 %3657  ;;  %8514 = vmatmul.mubr.msk.f32.vlgmr.msra.gmra.mrb[0].mxu0 %vm82_vm1, %v8513_v32 }
 0x133   :  { %v3669_v37 = vsel %vm3665_vm11, %v3654_v30, %v3656_v35  ;;  %3891 = vmatprep.mubr.f32.mxu0 %v8843_v4  ;;  %v3670_v43 = vsel %vm3665_vm11, %v3656_v35, %v3658_v36 }
 0x134   :  { %5655 = vrot.lane.b32.xlu0 %v9444_v38, %s8859_s21  ;;  %5973 = vrot.lane.b32.xlu1 %v9373_v18, %s8860_s14 }
 0x135   :  { %3756 = vmatprep.subr.mxu1 %v3669_v37 }
 0x136   :  { %3757 = vmatpush1.msra.mxu1 %v3668_v39  ;;  %v3660_v40 = vpop.permute.xlu0 %3659  ;;  %v3662_v41 = vpop.permute.xlu1 %3661 }
 0x137   :  { %v3671_v42 = vsel %vm3665_vm11, %v3658_v36, %v3660_v40  ;;  %8515 = vmatmul.mubr.msk.f32.vlgmr.msra.gmra.mrb[0].mxu1 %vm82_vm1, %v8513_v32  ;;  %v3672_v47 = vsel %vm3665_vm11, %v3660_v40, %v3662_v41 }
 0x138   :  { %5975 = vrot.lane.b32.xlu0 %v9380_v8, %s8860_s14  ;;  %5971 = vrot.lane.b32.xlu1 %v9391_v22, %s8860_s14 }
 0x139   :  { %3827 = vmatprep.subr.mxu0 %v3671_v42  ;;  %3962 = vmatprep.mubr.f32.mxu1 %v8843_v4 }
 0x13a   :  { %3828 = vmatpush1.msra.mxu0 %v3670_v43  ;;  %v3664_v44 = vpop.permute.xlu0 %3663  ;;  %v3982_v45 = vpop.permute.xlu1 %3981 }
 0x13b   :  { %v3673_v46 = vsel %vm3665_vm11, %v3662_v41, %v3664_v44  ;;  %8516 = vmatmul.mubr.msk.f32.vlgmr.msra.gmra.mrb[2].mxu0 %vm82_vm1, %v8513_v32 }
 0x13c   :  { %5977 = vrot.lane.b32.xlu0 %v9398_v23, %s8860_s14  ;;  %5979 = vrot.lane.b32.xlu1 %v9408_v27, %s8860_s14 }
 0x13d   :  { %3898 = vmatprep.subr.mxu1 %v3673_v46  ;;  %4081 = vmatprep.mubr.f32.mxu0 %v8843_v4 }
 0x13e   :  { %3899 = vmatpush1.msra.mxu1 %v3672_v47  ;;  %v3984_v48 = vpop.permute.xlu0 %3983  ;;  %v3980_v49 = vpop.permute.xlu1 %3979 }
 0x13f   :  { %v3998_v50 = vsel %vm3997_vm12, %v3980_v49, %v3982_v45  ;;  %v3999_v51 = vsel %vm3997_vm12, %v3982_v45, %v3984_v48  ;;  %8517 = vmatmul.mubr.msk.f32.vlgmr.msra.gmra.mrb[2].mxu1 %vm82_vm1, %v8513_v32 }
 0x140   :  { %5981 = vrot.lane.b32.xlu0 %v9415_v28, %s8860_s14  ;;  %5983 = vrot.lane.b32.xlu1 %v9427_v33, %s8860_s14 }
 0x141   :  { %4017 = vmatprep.subr.mxu0 %v3999_v51  ;;  %4152 = vmatprep.mubr.f32.mxu1 %v8843_v4 }
 0x142   :  { %4018 = vmatpush1.msra.mxu0 %v3998_v50  ;;  %v3986_v53 = vpop.permute.xlu0 %3985  ;;  %v3988_v54 = vpop.permute.xlu1 %3987 }
 0x143   :  { %v4001_v55 = vsel %vm3997_vm12, %v3986_v53, %v3988_v54  ;;  %v4000_v56 = vsel %vm3997_vm12, %v3984_v48, %v3986_v53  ;;  %8519 = vmatmul.mubr.msk.f32.vlgmr.msra.gmra.mrb[0].mxu0 %vm82_vm1, %v8518_v52  ;;  %v8533_v53 = vld [vmem:[%s9874_s1 + $0x78] sm:$0xff] }
 0x144   :  { %5985 = vrot.lane.b32.xlu0 %v9434_v34, %s8860_s14  ;;  %5987 = vrot.lane.b32.xlu1 %v9444_v38, %s8860_s14 }
 0x145   :  { %4088 = vmatprep.subr.mxu1 %v4001_v55  ;;  %4223 = vmatprep.mubr.f32.mxu0 %v8843_v4 }
 0x146   :  { %4089 = vmatpush1.msra.mxu1 %v4000_v56  ;;  %v3990_v57 = vpop.permute.xlu0 %3989  ;;  %v3992_v58 = vpop.permute.xlu1 %3991 }
 0x147   :  { %v4003_v59 = vsel %vm3997_vm12, %v3990_v57, %v3992_v58  ;;  %v4002_v60 = vsel %vm3997_vm12, %v3988_v54, %v3990_v57  ;;  %8520 = vmatmul.mubr.msk.f32.vlgmr.msra.gmra.mrb[0].mxu1 %vm82_vm1, %v8518_v52 }
 0x148   :  { %6305 = vrot.lane.b32.xlu0 %v9373_v18, %s8861_s16  ;;  %6307 = vrot.lane.b32.xlu1 %v9380_v8, %s8861_s16 }
 0x149   :  { %4159 = vmatprep.subr.mxu0 %v4003_v59  ;;  %4294 = vmatprep.mubr.f32.mxu1 %v8843_v4 }
 0x14a   :  { %4160 = vmatpush1.msra.mxu0 %v4002_v60  ;;  %v3994_v61 = vpop.permute.xlu0 %3993  ;;  %v3996_v0 = vpop.permute.xlu1 %3995 }
 0x14b   :  { %v4005_v62 = vsel %vm3997_vm12, %v3994_v61, %v3996_v0  ;;  %v4004_v63 = vsel %vm3997_vm12, %v3992_v58, %v3994_v61  ;;  %8521 = vmatmul.mubr.msk.f32.vlgmr.msra.gmra.mrb[2].mxu0 %vm82_vm1, %v8518_v52 }
 0x14c   :  { %6303 = vrot.lane.b32.xlu0 %v9391_v22, %s8861_s16  ;;  %6309 = vrot.lane.b32.xlu1 %v9398_v23, %s8861_s16 }
 0x14d   :  { %4230 = vmatprep.subr.mxu1 %v4005_v62  ;;  %4413 = vmatprep.mubr.f32.mxu0 %v8843_v4 }
 0x14e   :  { %4231 = vmatpush1.msra.mxu1 %v4004_v63  ;;  %v4314_v1 = vpop.permute.xlu0 %4313  ;;  %v4316_v2 = vpop.permute.xlu1 %4315 }
 0x14f   :  { %v4331_v10 = vsel %vm4329_vm13, %v4314_v1, %v4316_v2  ;;  %8522 = vmatmul.mubr.msk.f32.vlgmr.msra.gmra.mrb[2].mxu1 %vm82_vm1, %v8518_v52 }
 0x150   :  { %6311 = vrot.lane.b32.xlu0 %v9408_v27, %s8861_s16  ;;  %6313 = vrot.lane.b32.xlu1 %v9415_v28, %s8861_s16 }
 0x151   :  { %4349 = vmatprep.subr.mxu0 %v4331_v10  ;;  %4484 = vmatprep.mubr.f32.mxu1 %v8843_v4 }
 0x152   :  { %v4312_v11 = vpop.permute.xlu0 %4311  ;;  %v4318_v12 = vpop.permute.xlu1 %4317 }
 0x153   :  { %v4330_v3 = vsel %vm4329_vm13, %v4312_v11, %v4314_v1  ;;  %v4332_v6 = vsel %vm4329_vm13, %v4316_v2, %v4318_v12 }
 0x154   :  { %6315 = vrot.lane.b32.xlu0 %v9427_v33, %s8861_s16  ;;  %6317 = vrot.lane.b32.xlu1 %v9434_v34, %s8861_s16 }
 0x155   :  { %4350 = vmatpush1.msra.mxu0 %v4330_v3  ;;  %v8538_v3 = vld [vmem:[%s9874_s1 + $0x80] sm:$0xff] }
 0x156   :  { %v4320_v13 = vpop.permute.xlu0 %4319  ;;  %v4322_v14 = vpop.permute.xlu1 %4321  ;;  %8524 = vmatmul.mubr.msk.f32.vlgmr.msra.gmra.mrb[0].mxu0 %vm82_vm1, %v8523_v5 }
 0x157   :  { %v4333_v15 = vsel %vm4329_vm13, %v4318_v12, %v4320_v13  ;;  %4555 = vmatprep.mubr.f32.mxu0 %v8843_v4  ;;  %v4334_v9 = vsel %vm4329_vm13, %v4320_v13, %v4322_v14 }
 0x158   :  { %6319 = vrot.lane.b32.xlu0 %v9444_v38, %s8861_s16  ;;  %6637 = vrot.lane.b32.xlu1 %v9373_v18, %s8862_s19 }
 0x159   :  { %4420 = vmatprep.subr.mxu1 %v4333_v15 }
 0x15a   :  { %4421 = vmatpush1.msra.mxu1 %v4332_v6  ;;  %v4324_v7 = vpop.permute.xlu0 %4323  ;;  %v4326_v16 = vpop.permute.xlu1 %4325 }
 0x15b   :  { %v4335_v17 = vsel %vm4329_vm13, %v4322_v14, %v4324_v7  ;;  %8525 = vmatmul.mubr.msk.f32.vlgmr.msra.gmra.mrb[0].mxu1 %vm82_vm1, %v8523_v5  ;;  %v4336_v24 = vsel %vm4329_vm13, %v4324_v7, %v4326_v16 }
 0x15c   :  { %6639 = vrot.lane.b32.xlu0 %v9380_v8, %s8862_s19  ;;  %6635 = vrot.lane.b32.xlu1 %v9391_v22, %s8862_s19 }
 0x15d   :  { %4491 = vmatprep.subr.mxu0 %v4335_v17  ;;  %4626 = vmatprep.mubr.f32.mxu1 %v8843_v4 }
 0x15e   :  { %4492 = vmatpush1.msra.mxu0 %v4334_v9  ;;  %v4328_v19 = vpop.permute.xlu0 %4327  ;;  %v4646_v20 = vpop.permute.xlu1 %4645 }
 0x15f   :  { %v4337_v21 = vsel %vm4329_vm13, %v4326_v16, %v4328_v19  ;;  %8526 = vmatmul.mubr.msk.f32.vlgmr.msra.gmra.mrb[2].mxu0 %vm82_vm1, %v8523_v5 }
 0x160   :  { %6641 = vrot.lane.b32.xlu0 %v9398_v23, %s8862_s19  ;;  %6643 = vrot.lane.b32.xlu1 %v9408_v27, %s8862_s19 }
 0x161   :  { %4562 = vmatprep.subr.mxu1 %v4337_v21  ;;  %4745 = vmatprep.mubr.f32.mxu0 %v8843_v4 }
 0x162   :  { %4563 = vmatpush1.msra.mxu1 %v4336_v24  ;;  %v4648_v25 = vpop.permute.xlu0 %4647  ;;  %v4644_v26 = vpop.permute.xlu1 %4643 }
 0x163   :  { %v4662_v29 = vsel %vm4661_vm14, %v4644_v26, %v4646_v20  ;;  %v4663_v30 = vsel %vm4661_vm14, %v4646_v20, %v4648_v25  ;;  %8527 = vmatmul.mubr.msk.f32.vlgmr.msra.gmra.mrb[2].mxu1 %vm82_vm1, %v8523_v5 }
 0x164   :  { %6645 = vrot.lane.b32.xlu0 %v9415_v28, %s8862_s19  ;;  %6647 = vrot.lane.b32.xlu1 %v9427_v33, %s8862_s19 }
 0x165   :  { %4681 = vmatprep.subr.mxu0 %v4663_v30  ;;  %4816 = vmatprep.mubr.f32.mxu1 %v8843_v4 }
 0x166   :  { %4682 = vmatpush1.msra.mxu0 %v4662_v29  ;;  %v4650_v32 = vpop.permute.xlu0 %4649  ;;  %v4652_v35 = vpop.permute.xlu1 %4651 }
 0x167   :  { %v4665_v36 = vsel %vm4661_vm14, %v4650_v32, %v4652_v35  ;;  %v4664_v37 = vsel %vm4661_vm14, %v4648_v25, %v4650_v32  ;;  %8529 = vmatmul.mubr.msk.f32.vlgmr.msra.gmra.mrb[0].mxu0 %vm82_vm1, %v8528_v31  ;;  %v8543_v32 = vld [vmem:[%s9874_s1 + $0x88] sm:$0xff] }
 0x168   :  { %6649 = vrot.lane.b32.xlu0 %v9434_v34, %s8862_s19  ;;  %6651 = vrot.lane.b32.xlu1 %v9444_v38, %s8862_s19 }
 0x169   :  { %4752 = vmatprep.subr.mxu1 %v4665_v36  ;;  %4887 = vmatprep.mubr.f32.mxu0 %v8843_v4 }
 0x16a   :  { %4753 = vmatpush1.msra.mxu1 %v4664_v37  ;;  %v4654_v39 = vpop.permute.xlu0 %4653  ;;  %v4656_v40 = vpop.permute.xlu1 %4655 }
 0x16b   :  { %v4667_v41 = vsel %vm4661_vm14, %v4654_v39, %v4656_v40  ;;  %v4666_v42 = vsel %vm4661_vm14, %v4652_v35, %v4654_v39  ;;  %8530 = vmatmul.mubr.msk.f32.vlgmr.msra.gmra.mrb[0].mxu1 %vm82_vm1, %v8528_v31 }
 0x16c   :  { %6969 = vrot.lane.b32.xlu0 %v9373_v18, %s8863_s22  ;;  %6971 = vrot.lane.b32.xlu1 %v9380_v8, %s8863_s22 }
 0x16d   :  { %4823 = vmatprep.subr.mxu0 %v4667_v41  ;;  %4958 = vmatprep.mubr.f32.mxu1 %v8843_v4 }
 0x16e   :  { %4824 = vmatpush1.msra.mxu0 %v4666_v42  ;;  %v4658_v43 = vpop.permute.xlu0 %4657  ;;  %v4660_v44 = vpop.permute.xlu1 %4659 }
 0x16f   :  { %v4668_v45 = vsel %vm4661_vm14, %v4656_v40, %v4658_v43  ;;  %v4669_v46 = vsel %vm4661_vm14, %v4658_v43, %v4660_v44  ;;  %8531 = vmatmul.mubr.msk.f32.vlgmr.msra.gmra.mrb[2].mxu0 %vm82_vm1, %v8528_v31 }
 0x170   :  { %6967 = vrot.lane.b32.xlu0 %v9391_v22, %s8863_s22  ;;  %6973 = vrot.lane.b32.xlu1 %v9398_v23, %s8863_s22 }
 0x171   :  { %4894 = vmatprep.subr.mxu1 %v4669_v46  ;;  %5077 = vmatprep.mubr.f32.mxu0 %v8843_v4  ;;  %v8867_v46 = vmov 0  }
 0x172   :  { %4895 = vmatpush1.msra.mxu1 %v4668_v45  ;;  %v4978_v47 = vpop.permute.xlu0 %4977  ;;  %v4980_v48 = vpop.permute.xlu1 %4979  ;;  %8804 = vset.pattern.permute.xlu0 %v8867_v46 }
 0x173   :  { %v4995_v49 = vsel %vm4993_vm15, %v4978_v47, %v4980_v48  ;;  %8532 = vmatmul.mubr.msk.f32.vlgmr.msra.gmra.mrb[2].mxu1 %vm82_vm1, %v8528_v31 }
 0x174   :  { %6975 = vrot.lane.b32.xlu0 %v9408_v27, %s8863_s22  ;;  %6977 = vrot.lane.b32.xlu1 %v9415_v28, %s8863_s22 }
 0x175   :  { %5013 = vmatprep.subr.mxu0 %v4995_v49  ;;  %5148 = vmatprep.mubr.f32.mxu1 %v8843_v4 }
 0x176   :  { %v4976_v50 = vpop.permute.xlu0 %4975  ;;  %v4982_v51 = vpop.permute.xlu1 %4981 }
 0x177   :  { %v4994_v52 = vsel %vm4993_vm15, %v4976_v50, %v4978_v47  ;;  %v4996_v57 = vsel %vm4993_vm15, %v4980_v48, %v4982_v51 }
 0x178   :  { %6979 = vrot.lane.b32.xlu0 %v9427_v33, %s8863_s22  ;;  %6981 = vrot.lane.b32.xlu1 %v9434_v34, %s8863_s22 }
 0x179   :  { %5014 = vmatpush1.msra.mxu0 %v4994_v52 }
 0x17a   :  { %v4984_v54 = vpop.permute.xlu0 %4983  ;;  %v4986_v55 = vpop.permute.xlu1 %4985  ;;  %8534 = vmatmul.mubr.msk.f32.vlgmr.msra.gmra.mrb[0].mxu0 %vm82_vm1, %v8533_v53 }
 0x17b   :  { %v4997_v56 = vsel %vm4993_vm15, %v4982_v51, %v4984_v54  ;;  %5219 = vmatprep.mubr.f32.mxu0 %v8843_v4  ;;  %v4998_v61 = vsel %vm4993_vm15, %v4984_v54, %v4986_v55 }
 0x17c   :  { %6983 = vrot.lane.b32.xlu0 %v9444_v38, %s8863_s22  ;;  %7301 = vrot.lane.b32.xlu1 %v9373_v18, %s8864_s25 }
 0x17d   :  { %5084 = vmatprep.subr.mxu1 %v4997_v56 }
 0x17e   :  { %5085 = vmatpush1.msra.mxu1 %v4996_v57  ;;  %v4988_v58 = vpop.permute.xlu0 %4987  ;;  %v4990_v59 = vpop.permute.xlu1 %4989 }
 0x17f   :  { %v4999_v60 = vsel %vm4993_vm15, %v4986_v55, %v4988_v58  ;;  %8535 = vmatmul.mubr.msk.f32.vlgmr.msra.gmra.mrb[0].mxu1 %vm82_vm1, %v8533_v53  ;;  %v5000_v1 = vsel %vm4993_vm15, %v4988_v58, %v4990_v59 }
 0x180   :  { %7303 = vrot.lane.b32.xlu0 %v9380_v8, %s8864_s25  ;;  %7299 = vrot.lane.b32.xlu1 %v9391_v22, %s8864_s25 }
 0x181   :  { %5155 = vmatprep.subr.mxu0 %v4999_v60  ;;  %5290 = vmatprep.mubr.f32.mxu1 %v8843_v4 }
 0x182   :  { %5156 = vmatpush1.msra.mxu0 %v4998_v61  ;;  %v4992_v0 = vpop.permute.xlu0 %4991  ;;  %v5310_v62 = vpop.permute.xlu1 %5309 }
 0x183   :  { %v5001_v63 = vsel %vm4993_vm15, %v4990_v59, %v4992_v0  ;;  %8536 = vmatmul.mubr.msk.f32.vlgmr.msra.gmra.mrb[2].mxu0 %vm82_vm1, %v8533_v53 }
 0x184   :  { %7305 = vrot.lane.b32.xlu0 %v9398_v23, %s8864_s25  ;;  %7307 = vrot.lane.b32.xlu1 %v9408_v27, %s8864_s25 }
 0x185   :  { %5226 = vmatprep.subr.mxu1 %v5001_v63  ;;  %5409 = vmatprep.mubr.f32.mxu0 %v8843_v4 }
 0x186   :  { %5227 = vmatpush1.msra.mxu1 %v5000_v1  ;;  %v5312_v2 = vpop.permute.xlu0 %5311  ;;  %v5308_v10 = vpop.permute.xlu1 %5307 }
 0x187   :  { %v5326_v11 = vsel %vm5325_vm0, %v5308_v10, %v5310_v62  ;;  %v5327_v12 = vsel %vm5325_vm0, %v5310_v62, %v5312_v2  ;;  %8537 = vmatmul.mubr.msk.f32.vlgmr.msra.gmra.mrb[2].mxu1 %vm82_vm1, %v8533_v53  ;;  %v9711_v53 = vld [vmem:[%s9875_s2] sm:$0xff]  ;;  %v8553_v62 = vld [vmem:[%s9874_s1 + $0x98] sm:$0xff] }
 0x188   :  { %7309 = vrot.lane.b32.xlu0 %v9415_v28, %s8864_s25  ;;  %7311 = vrot.lane.b32.xlu1 %v9427_v33, %s8864_s25 }
 0x189   :  { %5345 = vmatprep.subr.mxu0 %v5327_v12  ;;  %5480 = vmatprep.mubr.f32.mxu1 %v8843_v4 }
 0x18a   :  { %5346 = vmatpush1.msra.mxu0 %v5326_v11  ;;  %v5314_v5 = vpop.permute.xlu0 %5313  ;;  %v5316_v13 = vpop.permute.xlu1 %5315 }
 0x18b   :  { %v5328_v14 = vsel %vm5325_vm0, %v5312_v2, %v5314_v5  ;;  %v5329_v15 = vsel %vm5325_vm0, %v5314_v5, %v5316_v13  ;;  %8539 = vmatmul.mubr.msk.f32.vlgmr.msra.gmra.mrb[0].mxu0 %vm82_vm1, %v8538_v3 }
 0x18c   :  { %7313 = vrot.lane.b32.xlu0 %v9434_v34, %s8864_s25  ;;  %7315 = vrot.lane.b32.xlu1 %v9444_v38, %s8864_s25 }
 0x18d   :  { %5416 = vmatprep.subr.mxu1 %v5329_v15  ;;  %5551 = vmatprep.mubr.f32.mxu0 %v8843_v4 }
 0x18e   :  { %5417 = vmatpush1.msra.mxu1 %v5328_v14  ;;  %v5318_v6 = vpop.permute.xlu0 %5317  ;;  %v5320_v7 = vpop.permute.xlu1 %5319 }
 0x18f   :  { %v5330_v16 = vsel %vm5325_vm0, %v5316_v13, %v5318_v6  ;;  %v5331_v17 = vsel %vm5325_vm0, %v5318_v6, %v5320_v7  ;;  %8540 = vmatmul.mubr.msk.f32.vlgmr.msra.gmra.mrb[0].mxu1 %vm82_vm1, %v8538_v3 }
 0x190   :  { %7633 = vrot.lane.b32.xlu0 %v9373_v18, %s8865_s28  ;;  %7635 = vrot.lane.b32.xlu1 %v9380_v8, %s8865_s28 }
 0x191   :  { %5487 = vmatprep.subr.mxu0 %v5331_v17  ;;  %5622 = vmatprep.mubr.f32.mxu1 %v8843_v4 }
 0x192   :  { %5488 = vmatpush1.msra.mxu0 %v5330_v16  ;;  %v5322_v9 = vpop.permute.xlu0 %5321  ;;  %v5324_v19 = vpop.permute.xlu1 %5323 }
 0x193   :  { %v5332_v20 = vsel %vm5325_vm0, %v5320_v7, %v5322_v9  ;;  %v5333_v21 = vsel %vm5325_vm0, %v5322_v9, %v5324_v19  ;;  %8541 = vmatmul.mubr.msk.f32.vlgmr.msra.gmra.mrb[2].mxu0 %vm82_vm1, %v8538_v3 }
 0x194   :  { %7631 = vrot.lane.b32.xlu0 %v9391_v22, %s8865_s28  ;;  %7637 = vrot.lane.b32.xlu1 %v9398_v23, %s8865_s28 }
 0x195   :  { %5558 = vmatprep.subr.mxu1 %v5333_v21  ;;  %5741 = vmatprep.mubr.f32.mxu0 %v8843_v4 }
 0x196   :  { %5559 = vmatpush1.msra.mxu1 %v5332_v20  ;;  %v5642_v24 = vpop.permute.xlu0 %5641  ;;  %v5644_v25 = vpop.permute.xlu1 %5643  ;;  %v8558_v20 = vld [vmem:[%s9874_s1 + $0xa0] sm:$0xff] }
 0x197   :  { %v5659_v26 = vsel %vm5657_vm2, %v5642_v24, %v5644_v25  ;;  %8542 = vmatmul.mubr.msk.f32.vlgmr.msra.gmra.mrb[2].mxu1 %vm82_vm1, %v8538_v3 }
 0x198   :  { %7639 = vrot.lane.b32.xlu0 %v9408_v27, %s8865_s28  ;;  %7641 = vrot.lane.b32.xlu1 %v9415_v28, %s8865_s28 }
 0x199   :  { %5677 = vmatprep.subr.mxu0 %v5659_v26  ;;  %5812 = vmatprep.mubr.f32.mxu1 %v8843_v4 }
 0x19a   :  { %v5640_v29 = vpop.permute.xlu0 %5639  ;;  %v5646_v30 = vpop.permute.xlu1 %5645 }
 0x19b   :  { %v5658_v31 = vsel %vm5657_vm2, %v5640_v29, %v5642_v24  ;;  %v5660_v39 = vsel %vm5657_vm2, %v5644_v25, %v5646_v30 }
 0x19c   :  { %7643 = vrot.lane.b32.xlu0 %v9427_v33, %s8865_s28  ;;  %7645 = vrot.lane.b32.xlu1 %v9434_v34, %s8865_s28 }
 0x19d   :  { %5678 = vmatpush1.msra.mxu0 %v5658_v31 }
 0x19e   :  { %v5648_v35 = vpop.permute.xlu0 %5647  ;;  %v5650_v36 = vpop.permute.xlu1 %5649  ;;  %8544 = vmatmul.mubr.msk.f32.vlgmr.msra.gmra.mrb[0].mxu0 %vm82_vm1, %v8543_v32 }
 0x19f   :  { %v5661_v37 = vsel %vm5657_vm2, %v5646_v30, %v5648_v35  ;;  %5883 = vmatprep.mubr.f32.mxu0 %v8843_v4  ;;  %v5662_v43 = vsel %vm5657_vm2, %v5648_v35, %v5650_v36 }
 0x1a0   :  { %7647 = vrot.lane.b32.xlu0 %v9444_v38, %s8865_s28  ;;  %7965 = vrot.lane.b32.xlu1 %v9373_v18, %s8866_s5 }
 0x1a1   :  { %5748 = vmatprep.subr.mxu1 %v5661_v37 }
 0x1a2   :  { %5749 = vmatpush1.msra.mxu1 %v5660_v39  ;;  %v5652_v40 = vpop.permute.xlu0 %5651  ;;  %v5654_v41 = vpop.permute.xlu1 %5653 }
 0x1a3   :  { %v5663_v42 = vsel %vm5657_vm2, %v5650_v36, %v5652_v40  ;;  %8545 = vmatmul.mubr.msk.f32.vlgmr.msra.gmra.mrb[0].mxu1 %vm82_vm1, %v8543_v32 }
 0x1a4   :  { %7967 = vrot.lane.b32.xlu0 %v9380_v8, %s8866_s5  ;;  %7963 = vrot.lane.b32.xlu1 %v9391_v22, %s8866_s5  ;;  %v5664_v8 = vsel %vm5657_vm2, %v5652_v40, %v5654_v41 }
 0x1a5   :  { %5819 = vmatprep.subr.mxu0 %v5663_v42  ;;  %5954 = vmatprep.mubr.f32.mxu1 %v8843_v4 }
 0x1a6   :  { %5820 = vmatpush1.msra.mxu0 %v5662_v43  ;;  %v5656_v18 = vpop.permute.xlu0 %5655  ;;  %v5974_v44 = vpop.permute.xlu1 %5973 }
 0x1a7   :  { %v5665_v45 = vsel %vm5657_vm2, %v5654_v41, %v5656_v18  ;;  %8546 = vmatmul.mubr.msk.f32.vlgmr.msra.gmra.mrb[2].mxu0 %vm82_vm1, %v8543_v32 }
 0x1a8   :  { %7969 = vrot.lane.b32.xlu0 %v9398_v23, %s8866_s5  ;;  %7971 = vrot.lane.b32.xlu1 %v9408_v27, %s8866_s5  ;;  %v8548_v23 = vld [vmem:[%s9874_s1 + $0x90] sm:$0xff] }
 0x1a9   :  { %5890 = vmatprep.subr.mxu1 %v5665_v45  ;;  %6073 = vmatprep.mubr.f32.mxu0 %v8843_v4 }
 0x1aa   :  { %5891 = vmatpush1.msra.mxu1 %v5664_v8  ;;  %v5976_v22 = vpop.permute.xlu0 %5975  ;;  %v5972_v47 = vpop.permute.xlu1 %5971 }
 0x1ab   :  { %v5990_v48 = vsel %vm5989_vm3, %v5972_v47, %v5974_v44  ;;  %v5991_v49 = vsel %vm5989_vm3, %v5974_v44, %v5976_v22  ;;  %8547 = vmatmul.mubr.msk.f32.vlgmr.msra.gmra.mrb[2].mxu1 %vm82_vm1, %v8543_v32  ;;  %v8563_v44 = vld [vmem:[%s9874_s1 + $0xa8] sm:$0xff] }
 0x1ac   :  { %7973 = vrot.lane.b32.xlu0 %v9415_v28, %s8866_s5  ;;  %7975 = vrot.lane.b32.xlu1 %v9427_v33, %s8866_s5 }
 0x1ad   :  { %6009 = vmatprep.subr.mxu0 %v5991_v49  ;;  %6144 = vmatprep.mubr.f32.mxu1 %v8843_v4 }
 0x1ae   :  { %6010 = vmatpush1.msra.mxu0 %v5990_v48  ;;  %v5978_v27 = vpop.permute.xlu0 %5977  ;;  %v5980_v50 = vpop.permute.xlu1 %5979 }
 0x1af   :  { %v5992_v51 = vsel %vm5989_vm3, %v5976_v22, %v5978_v27  ;;  %v5993_v52 = vsel %vm5989_vm3, %v5978_v27, %v5980_v50  ;;  %8549 = vmatmul.mubr.msk.f32.vlgmr.msra.gmra.mrb[0].mxu0 %vm82_vm1, %v8548_v23 }
 0x1b0   :  { %7977 = vrot.lane.b32.xlu0 %v9434_v34, %s8866_s5  ;;  %7979 = vrot.lane.b32.xlu1 %v9444_v38, %s8866_s5 }
 0x1b1   :  { %6080 = vmatprep.subr.mxu1 %v5993_v52  ;;  %6215 = vmatprep.mubr.f32.mxu0 %v8843_v4 }
 0x1b2   :  { %6081 = vmatpush1.msra.mxu1 %v5992_v51  ;;  %v5982_v28 = vpop.permute.xlu0 %5981  ;;  %v5984_v33 = vpop.permute.xlu1 %5983 }
 0x1b3   :  { %v5994_v54 = vsel %vm5989_vm3, %v5980_v50, %v5982_v28  ;;  %v5995_v55 = vsel %vm5989_vm3, %v5982_v28, %v5984_v33  ;;  %8550 = vmatmul.mubr.msk.f32.vlgmr.msra.gmra.mrb[0].mxu1 %vm82_vm1, %v8548_v23 }
 0x1b4   :  { %6151 = vmatprep.subr.mxu0 %v5995_v55  ;;  %6286 = vmatprep.mubr.f32.mxu1 %v8843_v4 }
 0x1b5   :  { %6152 = vmatpush1.msra.mxu0 %v5994_v54  ;;  %8296 = vperm.xlu0 %8804, %v9711_v53  }
 0x1b6   :  { %v5986_v34 = vpop.permute.xlu0 %5985  ;;  %v5988_v38 = vpop.permute.xlu1 %5987  ;;  %8551 = vmatmul.mubr.msk.f32.vlgmr.msra.gmra.mrb[2].mxu0 %vm82_vm1, %v8548_v23 }
 0x1b7   :  { %v5996_v56 = vsel %vm5989_vm3, %v5984_v33, %v5986_v34  ;;  %v5997_v57 = vsel %vm5989_vm3, %v5986_v34, %v5988_v38  ;;  %6405 = vmatprep.mubr.f32.mxu0 %v8843_v4  ;;  %v8568_v38 = vld [vmem:[%s9874_s1 + $0xb0] sm:$0xff] }
 0x1b8   :  { %6222 = vmatprep.subr.mxu1 %v5997_v57 }
 0x1b9   :  { %6223 = vmatpush1.msra.mxu1 %v5996_v56 }
 0x1ba   :  { %v6306_v58 = vpop.permute.xlu0 %6305  ;;  %v6308_v59 = vpop.permute.xlu1 %6307  ;;  %8552 = vmatmul.mubr.msk.f32.vlgmr.msra.gmra.mrb[2].mxu1 %vm82_vm1, %v8548_v23 }
 0x1bb   :  { %v6323_v60 = vsel %vm6321_vm4, %v6306_v58, %v6308_v59  ;;  %6476 = vmatprep.mubr.f32.mxu1 %v8843_v4 }
 0x1bc   :  { %6341 = vmatprep.subr.mxu0 %v6323_v60 }
 0x1be   :  { %v6304_v61 = vpop.permute.xlu0 %6303  ;;  %v6310_v0 = vpop.permute.xlu1 %6309 }
 0x1bf   :  { %v6322_v63 = vsel %vm6321_vm4, %v6304_v61, %v6306_v58  ;;  %v6324_v11 = vsel %vm6321_vm4, %v6308_v59, %v6310_v0 }
 0x1c0   :  { %6342 = vmatpush1.msra.mxu0 %v6322_v63 }
 0x1c1   :  { %8554 = vmatmul.mubr.msk.f32.vlgmr.msra.gmra.mrb[0].mxu0 %vm82_vm1, %v8553_v62 }
 0x1c2   :  { %v6312_v1 = vpop.permute.xlu0 %6311  ;;  %v6314_v2 = vpop.permute.xlu1 %6313  ;;  %6547 = vmatprep.mubr.f32.mxu0 %v8843_v4 }
 0x1c3   :  { %v6325_v10 = vsel %vm6321_vm4, %v6310_v0, %v6312_v1  ;;  %v6326_v13 = vsel %vm6321_vm4, %v6312_v1, %v6314_v2 }
 0x1c4   :  { %6412 = vmatprep.subr.mxu1 %v6325_v10 }
 0x1c5   :  { %6413 = vmatpush1.msra.mxu1 %v6324_v11 }
 0x1c6   :  { %v6316_v12 = vpop.permute.xlu0 %6315  ;;  %v6318_v3 = vpop.permute.xlu1 %6317  ;;  %8555 = vmatmul.mubr.msk.f32.vlgmr.msra.gmra.mrb[0].mxu1 %vm82_vm1, %v8553_v62 }
 0x1c7   :  { %v6327_v5 = vsel %vm6321_vm4, %v6314_v2, %v6316_v12  ;;  %6618 = vmatprep.mubr.f32.mxu1 %v8843_v4  ;;  %v6328_v7 = vsel %vm6321_vm4, %v6316_v12, %v6318_v3 }
 0x1c8   :  { %6483 = vmatprep.subr.mxu0 %v6327_v5 }
 0x1c9   :  { %6484 = vmatpush1.msra.mxu0 %v6326_v13 }
 0x1ca   :  { %v6320_v14 = vpop.permute.xlu0 %6319  ;;  %v6638_v15 = vpop.permute.xlu1 %6637  ;;  %8556 = vmatmul.mubr.msk.f32.vlgmr.msra.gmra.mrb[2].mxu0 %vm82_vm1, %v8553_v62 }
 0x1cb   :  { %v6329_v6 = vsel %vm6321_vm4, %v6318_v3, %v6320_v14  ;;  %6737 = vmatprep.mubr.f32.mxu0 %v8843_v4  ;;  %v8573_v14 = vld [vmem:[%s9874_s1 + $0xb8] sm:$0xff] }
 0x1cc   :  { %6554 = vmatprep.subr.mxu1 %v6329_v6 }
 0x1cd   :  { %6555 = vmatpush1.msra.mxu1 %v6328_v7 }
 0x1ce   :  { %v6640_v16 = vpop.permute.xlu0 %6639  ;;  %v6636_v17 = vpop.permute.xlu1 %6635  ;;  %8557 = vmatmul.mubr.msk.f32.vlgmr.msra.gmra.mrb[2].mxu1 %vm82_vm1, %v8553_v62 }
 0x1cf   :  { %v6654_v9 = vsel %vm6653_vm5, %v6636_v17, %v6638_v15  ;;  %v6655_v19 = vsel %vm6653_vm5, %v6638_v15, %v6640_v16  ;;  %6808 = vmatprep.mubr.f32.mxu1 %v8843_v4 }
 0x1d0   :  { %6673 = vmatprep.subr.mxu0 %v6655_v19 }
 0x1d1   :  { %6674 = vmatpush1.msra.mxu0 %v6654_v9 }
 0x1d2   :  { %v6642_v21 = vpop.permute.xlu0 %6641  ;;  %v6644_v24 = vpop.permute.xlu1 %6643  ;;  %8559 = vmatmul.mubr.msk.f32.vlgmr.msra.gmra.mrb[0].mxu0 %vm82_vm1, %v8558_v20 }
 0x1d3   :  { %v6656_v25 = vsel %vm6653_vm5, %v6640_v16, %v6642_v21  ;;  %v6657_v26 = vsel %vm6653_vm5, %v6642_v21, %v6644_v24  ;;  %6879 = vmatprep.mubr.f32.mxu0 %v8843_v4 }
 0x1d4   :  { %6744 = vmatprep.subr.mxu1 %v6657_v26 }
 0x1d5   :  { %6745 = vmatpush1.msra.mxu1 %v6656_v25 }
 0x1d6   :  { %v6646_v29 = vpop.permute.xlu0 %6645  ;;  %v6648_v30 = vpop.permute.xlu1 %6647  ;;  %8560 = vmatmul.mubr.msk.f32.vlgmr.msra.gmra.mrb[0].mxu1 %vm82_vm1, %v8558_v20 }
 0x1d7   :  { %v6658_v31 = vsel %vm6653_vm5, %v6644_v24, %v6646_v29  ;;  %v6659_v32 = vsel %vm6653_vm5, %v6646_v29, %v6648_v30  ;;  %6950 = vmatprep.mubr.f32.mxu1 %v8843_v4 }
 0x1d8   :  { %6815 = vmatprep.subr.mxu0 %v6659_v32 }
 0x1d9   :  { %6816 = vmatpush1.msra.mxu0 %v6658_v31 }
 0x1da   :  { %v6650_v35 = vpop.permute.xlu0 %6649  ;;  %v6652_v36 = vpop.permute.xlu1 %6651  ;;  %8561 = vmatmul.mubr.msk.f32.vlgmr.msra.gmra.mrb[2].mxu0 %vm82_vm1, %v8558_v20 }
 0x1db   :  { %v6660_v37 = vsel %vm6653_vm5, %v6648_v30, %v6650_v35  ;;  %v6661_v39 = vsel %vm6653_vm5, %v6650_v35, %v6652_v36  ;;  %7069 = vmatprep.mubr.f32.mxu0 %v8843_v4  ;;  %v8578_v36 = vld [vmem:[%s9874_s1 + $0xc0] sm:$0xff] }
 0x1dc   :  { %6886 = vmatprep.subr.mxu1 %v6661_v39 }
 0x1dd   :  { %6887 = vmatpush1.msra.mxu1 %v6660_v37 }
 0x1de   :  { %v6970_v40 = vpop.permute.xlu0 %6969  ;;  %v6972_v41 = vpop.permute.xlu1 %6971  ;;  %8562 = vmatmul.mubr.msk.f32.vlgmr.msra.gmra.mrb[2].mxu1 %vm82_vm1, %v8558_v20 }
 0x1df   :  { %v6987_v42 = vsel %vm6985_vm6, %v6970_v40, %v6972_v41  ;;  %7140 = vmatprep.mubr.f32.mxu1 %v8843_v4 }
 0x1e0   :  { %7005 = vmatprep.subr.mxu0 %v6987_v42 }
 0x1e2   :  { %v6968_v43 = vpop.permute.xlu0 %6967  ;;  %v6974_v18 = vpop.permute.xlu1 %6973 }
 0x1e3   :  { %v6986_v45 = vsel %vm6985_vm6, %v6968_v43, %v6970_v40  ;;  %v6988_v47 = vsel %vm6985_vm6, %v6972_v41, %v6974_v18 }
 0x1e4   :  { %7006 = vmatpush1.msra.mxu0 %v6986_v45 }
 0x1e5   :  { %8564 = vmatmul.mubr.msk.f32.vlgmr.msra.gmra.mrb[0].mxu0 %vm82_vm1, %v8563_v44 }
 0x1e6   :  { %v6976_v46 = vpop.permute.xlu0 %6975  ;;  %v6978_v8 = vpop.permute.xlu1 %6977  ;;  %7211 = vmatprep.mubr.f32.mxu0 %v8843_v4 }
 0x1e7   :  { %v6989_v22 = vsel %vm6985_vm6, %v6974_v18, %v6976_v46  ;;  %v6990_v27 = vsel %vm6985_vm6, %v6976_v46, %v6978_v8 }
 0x1e8   :  { %7076 = vmatprep.subr.mxu1 %v6989_v22 }
 0x1e9   :  { %7077 = vmatpush1.msra.mxu1 %v6988_v47  ;;  %v8868_v47 = vmov 1  }
 0x1ea   :  { %v6980_v48 = vpop.permute.xlu0 %6979  ;;  %v6982_v49 = vpop.permute.xlu1 %6981  ;;  %8565 = vmatmul.mubr.msk.f32.vlgmr.msra.gmra.mrb[0].mxu1 %vm82_vm1, %v8563_v44  ;;  %8805 = vset.pattern.permute.xlu1 %v8868_v47 }
 0x1eb   :  { %v6991_v23 = vsel %vm6985_vm6, %v6978_v8, %v6980_v48  ;;  %7282 = vmatprep.mubr.f32.mxu1 %v8843_v4  ;;  %v6992_v28 = vsel %vm6985_vm6, %v6980_v48, %v6982_v49  ;;  %v8869_v48 = vmov 2  }
 0x1ec   :  { %7147 = vmatprep.subr.mxu0 %v6991_v23  ;;  %8806 = vset.pattern.permute.xlu0 %v8869_v48 }
 0x1ed   :  { %7148 = vmatpush1.msra.mxu0 %v6990_v27  ;;  %v8307_v27 = vld [vmem:[%s9876_s3] sm:$0xff]  ;;  %s8870_s3 = smov [#allocation2]  }
 0x1ee   :  { %v6984_v50 = vpop.permute.xlu0 %6983  ;;  %v7302_v51 = vpop.permute.xlu1 %7301  ;;  %8566 = vmatmul.mubr.msk.f32.vlgmr.msra.gmra.mrb[2].mxu0 %vm82_vm1, %v8563_v44  ;;  %s8451_s21 = sshll.u32 %s8870_s3, 4  ;;  %s8452_s21 = int_to_ptr.vmem [resolvable:$true] %s8451_s21 }
 0x1ef   :  { %v6993_v52 = vsel %vm6985_vm6, %v6982_v49, %v6984_v50  ;;  %7401 = vmatprep.mubr.f32.mxu0 %v8843_v4  ;;  %v8309_v49 = vlaneseq  ;;  %s8818_s22 = scalar_lea.vmem %s8452_s21, 1024  ;;  %p8823_p1 = scmp.lt.s32.totalorder %s8452_s21, %s8452_s21 }
 0x1f0   :  { %7218 = vmatprep.subr.mxu1 %v6993_v52  ;;  %p8819_p0 = scmp.ne.s32.totalorder %s8452_s21, %s8818_s22  ;;  %p8824_p2 = scmp.lt.s32.totalorder %s8818_s22, %s8818_s22 }
 0x1f1   :  { %7219 = vmatpush1.msra.mxu1 %v6992_v28 }
 0x1f2   :  { %v7304_v33 = vpop.permute.xlu0 %7303  ;;  %v7300_v54 = vpop.permute.xlu1 %7299  ;;  %8567 = vmatmul.mubr.msk.f32.vlgmr.msra.gmra.mrb[2].mxu1 %vm82_vm1, %v8563_v44  ;;  %p8825_p3 = por %p8824_p2, %p8823_p1 }
 0x1f3   :  { %v7318_v55 = vsel %vm7317_vm7, %v7300_v54, %v7302_v51  ;;  %v7319_v34 = vsel %vm7317_vm7, %v7302_v51, %v7304_v33  ;;  %7472 = vmatprep.mubr.f32.mxu1 %v8843_v4 }
 0x1f4   :  { %7337 = vmatprep.subr.mxu0 %v7319_v34  ;;  %p8826_p4 = pnand %p8825_p3, %p8819_p0 }
 0x1f5   :  { %7338 = vmatpush1.msra.mxu0 %v7318_v55 }
 0x1f6   :  { %v7306_v56 = vpop.permute.xlu0 %7305  ;;  %v7308_v57 = vpop.permute.xlu1 %7307  ;;  %8569 = vmatmul.mubr.msk.f32.vlgmr.msra.gmra.mrb[0].mxu0 %vm82_vm1, %v8568_v38 }
 0x1f7   :  { %v7320_v58 = vsel %vm7317_vm7, %v7304_v33, %v7306_v56  ;;  %v7321_v59 = vsel %vm7317_vm7, %v7306_v56, %v7308_v57  ;;  %7543 = vmatprep.mubr.f32.mxu0 %v8843_v4 }
 0x1f8   :  { %7408 = vmatprep.subr.mxu1 %v7321_v59 }
 0x1f9   :  { %7409 = vmatpush1.msra.mxu1 %v7320_v58 }
 0x1fa   :  { %v7310_v60 = vpop.permute.xlu0 %7309  ;;  %v7312_v61 = vpop.permute.xlu1 %7311  ;;  %8570 = vmatmul.mubr.msk.f32.vlgmr.msra.gmra.mrb[0].mxu1 %vm82_vm1, %v8568_v38 }
 0x1fb   :  { %v7322_v0 = vsel %vm7317_vm7, %v7308_v57, %v7310_v60  ;;  %v7323_v62 = vsel %vm7317_vm7, %v7310_v60, %v7312_v61  ;;  %7614 = vmatprep.mubr.f32.mxu1 %v8843_v4 }
 0x1fc   :  { %7479 = vmatprep.subr.mxu0 %v7323_v62 }
 0x1fd   :  { %7480 = vmatpush1.msra.mxu0 %v7322_v0 }
 0x1fe   :  { %v7314_v63 = vpop.permute.xlu0 %7313  ;;  %v7316_v1 = vpop.permute.xlu1 %7315  ;;  %8571 = vmatmul.mubr.msk.f32.vlgmr.msra.gmra.mrb[2].mxu0 %vm82_vm1, %v8568_v38 }
 0x1ff   :  { %v7324_v2 = vsel %vm7317_vm7, %v7312_v61, %v7314_v63  ;;  %v7325_v10 = vsel %vm7317_vm7, %v7314_v63, %v7316_v1  ;;  %7733 = vmatprep.mubr.f32.mxu0 %v8843_v4 }
 0x200   :  { %7550 = vmatprep.subr.mxu1 %v7325_v10 }
 0x201   :  { %7551 = vmatpush1.msra.mxu1 %v7324_v2 }
 0x202   :  { %v7634_v11 = vpop.permute.xlu0 %7633  ;;  %v7636_v12 = vpop.permute.xlu1 %7635  ;;  %8572 = vmatmul.mubr.msk.f32.vlgmr.msra.gmra.mrb[2].mxu1 %vm82_vm1, %v8568_v38 }
 0x203   :  { %v7651_v3 = vsel %vm7649_vm8, %v7634_v11, %v7636_v12  ;;  %7804 = vmatprep.mubr.f32.mxu1 %v8843_v4 }
 0x204   :  { %7669 = vmatprep.subr.mxu0 %v7651_v3 }
 0x206   :  { %v7632_v5 = vpop.permute.xlu0 %7631  ;;  %v7638_v13 = vpop.permute.xlu1 %7637 }
 0x207   :  { %v7650_v15 = vsel %vm7649_vm8, %v7632_v5, %v7634_v11  ;;  %v7652_v17 = vsel %vm7649_vm8, %v7636_v12, %v7638_v13 }
 0x208   :  { %7670 = vmatpush1.msra.mxu0 %v7650_v15 }
 0x209   :  { %8574 = vmatmul.mubr.msk.f32.vlgmr.msra.gmra.mrb[0].mxu0 %vm82_vm1, %v8573_v14 }
 0x20a   :  { %v7640_v6 = vpop.permute.xlu0 %7639  ;;  %v7642_v7 = vpop.permute.xlu1 %7641  ;;  %7875 = vmatprep.mubr.f32.mxu0 %v8843_v4 }
 0x20b   :  { %v7653_v16 = vsel %vm7649_vm8, %v7638_v13, %v7640_v6  ;;  %v7654_v21 = vsel %vm7649_vm8, %v7640_v6, %v7642_v7 }
 0x20c   :  { %7740 = vmatprep.subr.mxu1 %v7653_v16 }
 0x20d   :  { %7741 = vmatpush1.msra.mxu1 %v7652_v17 }
 0x20e   :  { %v7644_v9 = vpop.permute.xlu0 %7643  ;;  %v7646_v19 = vpop.permute.xlu1 %7645  ;;  %8575 = vmatmul.mubr.msk.f32.vlgmr.msra.gmra.mrb[0].mxu1 %vm82_vm1, %v8573_v14 }
 0x20f   :  { %v7655_v20 = vsel %vm7649_vm8, %v7642_v7, %v7644_v9  ;;  %7946 = vmatprep.mubr.f32.mxu1 %v8843_v4  ;;  %v7656_v29 = vsel %vm7649_vm8, %v7644_v9, %v7646_v19 }
 0x210   :  { %7811 = vmatprep.subr.mxu0 %v7655_v20 }
 0x211   :  { %7812 = vmatpush1.msra.mxu0 %v7654_v21 }
 0x212   :  { %v7648_v24 = vpop.permute.xlu0 %7647  ;;  %v7966_v25 = vpop.permute.xlu1 %7965  ;;  %8576 = vmatmul.mubr.msk.f32.vlgmr.msra.gmra.mrb[2].mxu0 %vm82_vm1, %v8573_v14 }
 0x213   :  { %v7657_v26 = vsel %vm7649_vm8, %v7646_v19, %v7648_v24  ;;  %8065 = vmatprep.mubr.f32.mxu0 %v8843_v4 }
 0x214   :  { %7882 = vmatprep.subr.mxu1 %v7657_v26 }
 0x215   :  { %7883 = vmatpush1.msra.mxu1 %v7656_v29 }
 0x216   :  { %v7968_v30 = vpop.permute.xlu0 %7967  ;;  %v7964_v31 = vpop.permute.xlu1 %7963  ;;  %8577 = vmatmul.mubr.msk.f32.vlgmr.msra.gmra.mrb[2].mxu1 %vm82_vm1, %v8573_v14 }
 0x217   :  { %v7982_v32 = vsel %vm7981_vm9, %v7964_v31, %v7966_v25  ;;  %v7983_v35 = vsel %vm7981_vm9, %v7966_v25, %v7968_v30  ;;  %8136 = vmatprep.mubr.f32.mxu1 %v8843_v4 }
 0x218   :  { %8001 = vmatprep.subr.mxu0 %v7983_v35 }
 0x219   :  { %8002 = vmatpush1.msra.mxu0 %v7982_v32 }
 0x21a   :  { %v7970_v37 = vpop.permute.xlu0 %7969  ;;  %v7972_v39 = vpop.permute.xlu1 %7971  ;;  %8579 = vmatmul.mubr.msk.f32.vlgmr.msra.gmra.mrb[0].mxu0 %vm82_vm1, %v8578_v36 }
 0x21b   :  { %v7984_v40 = vsel %vm7981_vm9, %v7968_v30, %v7970_v37  ;;  %v7985_v41 = vsel %vm7981_vm9, %v7970_v37, %v7972_v39  ;;  %8207 = vmatprep.mubr.f32.mxu0 %v8843_v4 }
 0x21c   :  { %8072 = vmatprep.subr.mxu1 %v7985_v41 }
 0x21d   :  { %8073 = vmatpush1.msra.mxu1 %v7984_v40 }
 0x21e   :  { %v7974_v42 = vpop.permute.xlu0 %7973  ;;  %v7976_v43 = vpop.permute.xlu1 %7975  ;;  %8580 = vmatmul.mubr.msk.f32.vlgmr.msra.gmra.mrb[0].mxu1 %vm82_vm1, %v8578_v36 }
 0x21f   :  { %v7986_v18 = vsel %vm7981_vm9, %v7972_v39, %v7974_v42  ;;  %v7987_v44 = vsel %vm7981_vm9, %v7974_v42, %v7976_v43  ;;  %8278 = vmatprep.mubr.f32.mxu1 %v8843_v4  ;;  %v8310_v4 = vshrl.u32 %v8309_v49, 7 }
 0x220   :  { %8143 = vmatprep.subr.mxu0 %v7987_v44 }
 0x221   :  { %8144 = vmatpush1.msra.mxu0 %v7986_v18  ;;  %v8311_v23 = vsub.s32 0, %v8310_v4  ;;  %v8315_v50 = vsub.s32 1, %v8310_v4  ;;  %v8319_v28 = vsub.s32 2, %v8310_v4  ;;  %v8323_v55 = vsub.s32 3, %v8310_v4 }
 0x222   :  { %v7978_v45 = vpop.permute.xlu0 %7977  ;;  %v7980_v46 = vpop.permute.xlu1 %7979  ;;  %8581 = vmatmul.mubr.msk.f32.vlgmr.msra.gmra.mrb[2].mxu0 %vm82_vm1, %v8578_v36  ;;  %v8327_v59 = vsub.s32 4, %v8310_v4  ;;  %v8331_v62 = vsub.s32 5, %v8310_v4  ;;  %v8335_v13 = vsub.s32 6, %v8310_v4  ;;  %v8339_v16 = vsub.s32 7, %v8310_v4 }
 0x223   :  { %v7988_v8 = vsel %vm7981_vm9, %v7976_v43, %v7978_v45  ;;  %v7989_v22 = vsel %vm7981_vm9, %v7978_v45, %v7980_v46  ;;  %v8312_v52 = vrot.slane %v8307_v27, %v8311_v23  ;;  %v8316_v54 = vrot.slane %v8307_v27, %v8315_v50 }
 0x224   :  { %8214 = vmatprep.subr.mxu1 %v7989_v22  ;;  %v8320_v58 = vrot.slane %v8307_v27, %v8319_v28  ;;  %v8324_v0 = vrot.slane %v8307_v27, %v8323_v55  ;;  %v8328_v5 = vrot.slane %v8307_v27, %v8327_v59  ;;  %v8332_v7 = vrot.slane %v8307_v27, %v8331_v62 }
 0x225   :  { %8215 = vmatpush1.msra.mxu1 %v7988_v8  ;;  %v8336_v30 = vrot.slane %v8307_v27, %v8335_v13  ;;  %v8340_v35 = vrot.slane %v8307_v27, %v8339_v16 }
 0x226   :  { %8582 = vmatmul.mubr.msk.f32.vlgmr.msra.gmra.mrb[2].mxu1 %vm82_vm1, %v8578_v36 }
 0x234   :  { %v8297_v51 = vpop.permute.xlu0 %8296 }
 0x2ed   :  { %v8067_v33 = vpop.f32.mrb[0].mxu0 }
 0x2ee   :  { %v9839_v34 = vadd.f32 %v8297_v51, %v8067_v33  ;;  %v8069_v38 = vpop.f32.mrb[1].mxu0 }
 0x2ef   :  { %v9841_v56 = vadd.f32 %v8297_v51, %v8069_v38 }
 0x2f0   :  { %v8349_v57 = vmul.f32 %v8312_v52, %v9839_v34 }
 0x2f1   :  { %v8350_v60 = vmul.f32 %v8316_v54, %v9841_v56  ;;  %v8138_v61 = vpop.f32.mrb[0].mxu1 }
 0x2f2   :  { %v8367_v63 = vmul.f32 %v8349_v57, %v9839_v34  ;;  %v9846_v1 = vadd.f32 %v8297_v51, %v8138_v61  ;;  %v8140_v2 = vpop.f32.mrb[1].mxu1 }
 0x2f3   :  { %v8357_v10 = vadd.f32 %v8350_v60, %v8349_v57  ;;  %v8368_v11 = vmul.f32 %v8350_v60, %v9841_v56  ;;  %v9849_v12 = vadd.f32 %v8297_v51, %v8140_v2 }
 0x2f4   :  { %v8351_v3 = vmul.f32 %v8320_v58, %v9846_v1 }
 0x2f5   :  { %v8375_v14 = vadd.f32 %v8368_v11, %v8367_v63  ;;  %v8352_v15 = vmul.f32 %v8324_v0, %v9849_v12  ;;  %v8209_v6 = vpop.f32.mrb[2].mxu0 }
 0x2f6   :  { %v8358_v17 = vadd.f32 %v8357_v10, %v8351_v3  ;;  %v8369_v9 = vmul.f32 %v8351_v3, %v9846_v1  ;;  %v8303_v19 = vadd.f32 %v8297_v51, %v8209_v6  ;;  %v8211_v20 = vpop.f32.mrb[3].mxu0 }
 0x2f7   :  { %v8370_v21 = vmul.f32 %v8352_v15, %v9849_v12  ;;  %v8304_v24 = vadd.f32 %v8297_v51, %v8211_v20 }
 0x2f8   :  { %v8376_v25 = vadd.f32 %v8375_v14, %v8369_v9  ;;  %v8359_v26 = vadd.f32 %v8358_v17, %v8352_v15  ;;  %v8353_v29 = vmul.f32 %v8328_v5, %v8303_v19 }
 0x2f9   :  { %v8354_v31 = vmul.f32 %v8332_v7, %v8304_v24  ;;  %v8280_v32 = vpop.f32.mrb[2].mxu1 }
 0x2fa   :  { %v8377_v36 = vadd.f32 %v8376_v25, %v8370_v21  ;;  %v8360_v37 = vadd.f32 %v8359_v26, %v8353_v29  ;;  %v8371_v39 = vmul.f32 %v8353_v29, %v8303_v19  ;;  %v8305_v40 = vadd.f32 %v8297_v51, %v8280_v32  ;;  %v8282_v41 = vpop.f32.mrb[3].mxu1 }
 0x2fb   :  { %v8372_v42 = vmul.f32 %v8354_v31, %v8304_v24  ;;  %v8306_v43 = vadd.f32 %v8297_v51, %v8282_v41 }
 0x2fc   :  { %v8378_v18 = vadd.f32 %v8377_v36, %v8371_v39  ;;  %v8361_v44 = vadd.f32 %v8360_v37, %v8354_v31  ;;  %v8355_v45 = vmul.f32 %v8336_v30, %v8305_v40 }
 0x2fd   :  { %v8356_v46 = vmul.f32 %v8340_v35, %v8306_v43 }
 0x2fe   :  { %v8379_v8 = vadd.f32 %v8378_v18, %v8372_v42  ;;  %v8373_v22 = vmul.f32 %v8355_v45, %v8305_v40  ;;  %v8362_v47 = vadd.f32 %v8361_v44, %v8355_v45 }
 0x2ff   :  { %v8374_v48 = vmul.f32 %v8356_v46, %v8306_v43 }
 0x300   :  { %v8363_v49 = vadd.f32 %v8362_v47, %v8356_v46  ;;  %v8380_v4 = vadd.f32 %v8379_v8, %v8373_v22 }
 0x302   :  { %8364 = vadd.xlane.f32.xlu1 %v8363_v49  ;;  %v8381_v23 = vadd.f32 %v8380_v4, %v8374_v48 }
 0x304   :  { %8382 = vadd.xlane.f32.xlu0 %v8381_v23 }
 0x313   :  { %8406 = vperm.xlu1 %8805, %v9711_v53  }
 0x31a   :  { %8418 = vperm.xlu0 %8806, %v9711_v53  }
 0x38f   :  { %v8365_v27 = vpop.xlane.xlu1 %8364 }
 0x390   :  { %v8366_v50 = vmul.f32 0.001953125, %v8365_v27 }
 0x391   :  { %v8383_v51 = vpop.xlane.xlu0 %8382 }
 0x392   :  { %v8384_v52 = vmul.f32 0.001953125, %v8383_v51  ;;  %v8385_v28 = vmul.f32 %v8366_v50, %v8366_v50  ;;  %v8387_v55 = vsub.f32 %v9839_v34, %v8366_v50  ;;  %v8388_v38 = vsub.f32 %v9841_v56, %v8366_v50 }
 0x393   :  { %v8389_v57 = vsub.f32 %v9846_v1, %v8366_v50  ;;  %v8390_v58 = vsub.f32 %v9849_v12, %v8366_v50  ;;  %v8391_v60 = vsub.f32 %v8303_v19, %v8366_v50  ;;  %v8392_v61 = vsub.f32 %v8304_v24, %v8366_v50  ;;  %v8407_v62 = vpop.permute.xlu1 %8406 }
 0x394   :  { %v8386_v33 = vsub.f32 %v8384_v52, %v8385_v28  ;;  %v8393_v53 = vsub.f32 %v8305_v40, %v8366_v50  ;;  %v8394_v0 = vsub.f32 %v8306_v43, %v8366_v50 }
 0x396   :  { %v8395_v54 = vadd.f32 1e-05, %v8386_v33 }
 0x398   :  { %8807 = vrsqrt.f32 %v8395_v54 }
 0x399   :  { %v8419_v14 = vpop.permute.xlu0 %8418 }
 0x3a2   :  { %v8808_v59 = vpop.eup %8807 }
 0x3a3   :  { %v8397_v63 = vmul.f32 %v8808_v59, %v8387_v55  ;;  %v8398_v2 = vmul.f32 %v8808_v59, %v8388_v38  ;;  %v8399_v10 = vmul.f32 %v8808_v59, %v8389_v57  ;;  %v8400_v11 = vmul.f32 %v8808_v59, %v8390_v58 }
 0x3a4   :  { %v8401_v3 = vmul.f32 %v8808_v59, %v8391_v60  ;;  %v8402_v5 = vmul.f32 %v8808_v59, %v8392_v61  ;;  %v8403_v13 = vmul.f32 %v8808_v59, %v8393_v53  ;;  %v8404_v34 = vmul.f32 %v8808_v59, %v8394_v0 }
 0x3a5   :  { %v8409_v56 = vmul.f32 %v8407_v62, %v8397_v63  ;;  %v8410_v15 = vmul.f32 %v8407_v62, %v8398_v2  ;;  %v8411_v1 = vmul.f32 %v8407_v62, %v8399_v10  ;;  %v8412_v6 = vmul.f32 %v8407_v62, %v8400_v11 }
 0x3a6   :  { %v8413_v12 = vmul.f32 %v8407_v62, %v8401_v3  ;;  %v8414_v7 = vmul.f32 %v8407_v62, %v8402_v5  ;;  %v8415_v16 = vmul.f32 %v8407_v62, %v8403_v13  ;;  %v8416_v17 = vmul.f32 %v8407_v62, %v8404_v34 }
 0x3a7   :  { %v8421_v9 = vadd.f32 %v8419_v14, %v8409_v56  ;;  %v8422_v19 = vadd.f32 %v8419_v14, %v8410_v15  ;;  %v8423_v20 = vadd.f32 %v8419_v14, %v8411_v1  ;;  %v8424_v21 = vadd.f32 %v8419_v14, %v8412_v6 }
 0x3a8   :  { %v8425_v24 = vadd.f32 %v8419_v14, %v8413_v12  ;;  %v8426_v25 = vadd.f32 %v8419_v14, %v8414_v7  ;;  %v8427_v26 = vadd.f32 %v8419_v14, %v8415_v16  ;;  %v8428_v29 = vadd.f32 %v8419_v14, %v8416_v17 }
 0x3a9   :  { %v8429_v30 = vmax.f32 %v8421_v9, 0.0  ;;  %v8430_v31 = vmax.f32 %v8422_v19, 0.0  ;;  %v8431_v32 = vmax.f32 %v8423_v20, 0.0  ;;  %v8432_v35 = vmax.f32 %v8424_v21, 0.0 }
 0x3aa   :  { %v8433_v36 = vmax.f32 %v8425_v24, 0.0  ;;  %v8434_v37 = vmax.f32 %v8426_v25, 0.0  ;;  %v8435_v39 = vmax.f32 %v8427_v26, 0.0  ;;  %v8436_v40 = vmax.f32 %v8428_v29, 0.0 }
 0x3ab   :  { %8437 = vst [vmem:[#allocation2] sm:$0xff] %v8429_v30  ;;  %8438 = vst [vmem:[#allocation2 + $0x8] sm:$0xff] %v8430_v31 }
 0x3ac   :  { %8439 = vst [vmem:[#allocation2 + $0x10] sm:$0xff] %v8431_v32  ;;  %8440 = vst [vmem:[#allocation2 + $0x18] sm:$0xff] %v8432_v35 }
 0x3ad   :  { %8441 = vst [vmem:[#allocation2 + $0x20] sm:$0xff] %v8433_v36  ;;  %8442 = vst [vmem:[#allocation2 + $0x28] sm:$0xff] %v8434_v37 }
 0x3ae   :  { %8443 = vst [vmem:[#allocation2 + $0x30] sm:$0xff] %v8435_v39  ;;  %8444 = vst [vmem:[#allocation2 + $0x38] sm:$0xff] %v8436_v40 }
 0x3af   :  { %8829 = shalt.err (!%p8826_p4)
}
 0x3b0   :  { %s8830_s25 = scalar_lea.hbm %s9877_s4, 1024 }
 0x3b1   :  { %p8831_p5 = scmp.ne.s32.totalorder %s9877_s4, %s8830_s25  ;;  %p8834_p6 = scmp.lt.u32.totalorder %s8830_s25, %s9877_s4 }
 0x3b3   :  { %p8836_p7 = pnand %p8834_p6, %p8831_p5 }
 0x3b5   :  { %8839 = shalt.err (!%p8836_p7)
}
 0x3b6   :  { %8454 = dma.vmem_to_hbm [thread:$0]  %s8452_s21, 1024, %s9877_s4, [#allocation3]  }
 0x3b7   :  { %8840 = dma.done.wait [#allocation3], 1024  }
 0x3b8   :  { %8841 = vsyncadd [#allocation3], 4294966272 }
 0x3b9   :  { %8458 = vsyncpa [#allocation3], 1 }

</bundles_post_ra>
